<compile_context>
chip_gen: v7x
topology: tpu7x:2x2x1
jax: 0.10.0
libtpu: 0.0.40
codegen_flags: <defaults>
</compile_context>

<pallas_src>
import jax
import jax.numpy as jnp
from jax.experimental import pallas as pl
from jax.experimental.pallas import tpu as pltpu


def sdpa_kernel(scale_ref, q_ref, k_ref, v_ref, out_ref, attn_ref):
    f32 = jnp.float32
    scale = scale_ref[0, 0]

    q = q_ref[...]   # (Bh, Lq, dk)
    k = k_ref[...]   # (Bh, dk, Lk)
    v = v_ref[...]   # (Bh, Lk, dv)

    # scores[b, i, j] = sum_d q[b, i, d] * k[b, d, j]  -- batched MXU matmul over the
    # block of batch-heads (head axis is a batch dim, never a lane slice).
    scores = jnp.einsum('bqd,bdk->bqk', q, k, preferred_element_type=f32) * scale

    # numerically-stable softmax along the key axis
    m = jnp.max(scores, axis=-1, keepdims=True)
    e = jnp.exp(scores - m)
    denom = jnp.sum(e, axis=-1, keepdims=True)
    attn = e * pl.reciprocal(denom, approx=True)   # EUP reciprocal instead of VPU divide

    out = jnp.einsum('bqk,bkd->bqd', attn.astype(v.dtype), v,
                     preferred_element_type=f32)

    out_ref[...] = out.astype(out_ref.dtype)
    attn_ref[...] = attn.astype(attn_ref.dtype)


def scaled_dot_product_attention(q, k, v, scale, *, block_bh=4):
    """q: [bs, H, Lq, dk], k: [bs, H, dk, Lk] (pre-transposed), v: [bs, H, Lk, dv].

    Returns (output [bs, H, Lq, dv], attn_weights [bs, H, Lq, Lk]), matching the
    PyTorch module's default forward (no prev / masks, dropout p=0, res_attention=False).
    """
    # TODO(synk): optional prev / attn_mask / key_padding_mask inputs and attn_dropout>0
    # paths of the PyTorch module (all None / 0.0 in the default forward) are not wired in.
    bs, H, Lq, dk = q.shape
    Lk = k.shape[-1]
    dv = v.shape[-1]
    BH = bs * H

    qf = q.reshape(BH, Lq, dk)
    kf = k.reshape(BH, dk, Lk)
    vf = v.reshape(BH, Lk, dv)
    scale_arr = jnp.asarray(scale, jnp.float32).reshape(1, 1)

    # Block over the batch-head axis (amortizes per-grid-step overhead, keeps VMEM small).
    block_bh = max(1, min(block_bh, BH))
    while BH % block_bh:
        block_bh -= 1
    grid = (BH // block_bh,)

    out_f, attn_f = pl.pallas_call(
        sdpa_kernel,
        grid=grid,
        in_specs=[
            pl.BlockSpec((1, 1), lambda i: (0, 0),
                         memory_space=pltpu.MemorySpace.SMEM),      # learnable scalar scale
            pl.BlockSpec((block_bh, Lq, dk), lambda i: (i, 0, 0)),
            pl.BlockSpec((block_bh, dk, Lk), lambda i: (i, 0, 0)),
            pl.BlockSpec((block_bh, Lk, dv), lambda i: (i, 0, 0)),
        ],
        out_specs=[
            pl.BlockSpec((block_bh, Lq, dv), lambda i: (i, 0, 0)),
            pl.BlockSpec((block_bh, Lq, Lk), lambda i: (i, 0, 0)),
        ],
        out_shape=[
            jax.ShapeDtypeStruct((BH, Lq, dv), q.dtype),
            jax.ShapeDtypeStruct((BH, Lq, Lk), jnp.float32),
        ],
        compiler_params=pltpu.CompilerParams(
            dimension_semantics=("parallel",),        # shard across TCs on v7x / megacore
            vmem_limit_bytes=32 * 1024 * 1024,        # explicit budget, valid on v5e/v6e/v7x
        ),
    )(scale_arr, qf, kf, vf)

    return (out_f.reshape(bs, H, Lq, dv),
            attn_f.reshape(bs, H, Lq, Lk))


def reference(q, k, v, scale):
    # Pure-JAX reference with identical math (high precision for the comparison).
    hi = jax.lax.Precision.HIGHEST
    scores = jnp.einsum('bhqd,bhdk->bhqk', q.astype(jnp.float32), k.astype(jnp.float32),
                        precision=hi) * scale
    attn = jax.nn.softmax(scores, axis=-1)
    out = jnp.einsum('bhqk,bhkd->bhqd', attn, v.astype(jnp.float32), precision=hi)
    return out.astype(q.dtype), attn


if __name__ == "__main__":
    # Small shapes consistent with the module: d_model=512, n_heads=4 -> head_dim=128,
    # q_len = seq_len = 128, batch = 2.  head_dim/seq chosen as multiples of 128 so every
    # load/store is lane-dense (per the perf review); any other shape remains valid because
    # blocks only tile the batch-head axis.
    bs, n_heads, q_len, seq_len, head_dim = 2, 4, 128, 128, 128
    scale = head_dim ** (-0.5)        # lsa=False -> fixed (non-trained) scalar parameter

    key = jax.random.PRNGKey(0)
    kq, kk, kv = jax.random.split(key, 3)
    q = jax.random.normal(kq, (bs, n_heads, q_len, head_dim), jnp.float32)
    k = jax.random.normal(kk, (bs, n_heads, head_dim, seq_len), jnp.float32)  # pre-transposed
    v = jax.random.normal(kv, (bs, n_heads, seq_len, head_dim), jnp.float32)

    out, attn = scaled_dot_product_attention(q, k, v, scale, block_bh=4)
    out = jax.block_until_ready(out)
    attn = jax.block_until_ready(attn)

    ref_out, ref_attn = reference(q, k, v, scale)
    assert out.shape == (bs, n_heads, q_len, head_dim)
    assert attn.shape == (bs, n_heads, q_len, seq_len)
    assert jnp.allclose(attn, ref_attn, atol=5e-3, rtol=5e-3), "attn mismatch vs JAX reference"
    assert jnp.allclose(out, ref_out, atol=5e-3, rtol=5e-3), "output mismatch vs JAX reference"

    print("KERNEL_OK")
</pallas_src>

<mosaic_0001>
module attributes {stable_mosaic.version = 11 : i64} {
  func.func @sdpa_kernel(%arg0: i32, %arg1: memref<1x1xf32, #tpu.memory_space<smem>>, %arg2: memref<4x128x128xf32, #tpu.memory_space<vmem>>, %arg3: memref<4x128x128xf32, #tpu.memory_space<vmem>>, %arg4: memref<4x128x128xf32, #tpu.memory_space<vmem>>, %arg5: memref<4x128x128xf32, #tpu.memory_space<vmem>>, %arg6: memref<4x128x128xf32, #tpu.memory_space<vmem>>) attributes {dimension_semantics = [#tpu.dimension_semantics<parallel>], iteration_bounds = array<i64: 2>, scalar_prefetch = 0 : i64, scratch_operands = 0 : i64, tpu.core_type = #tpu.core_type<tc>, window_params = [{transform_indices = @transform_0, window_bounds = array<i64: 1, 1>}, {transform_indices = @transform_1, window_bounds = array<i64: 4, 128, 128>}, {transform_indices = @transform_2, window_bounds = array<i64: 4, 128, 128>}, {transform_indices = @transform_3, window_bounds = array<i64: 4, 128, 128>}, {transform_indices = @transform_4, window_bounds = array<i64: 4, 128, 128>}, {transform_indices = @transform_5, window_bounds = array<i64: 4, 128, 128>}]} {
    %c0 = arith.constant 0 : index
    %c0_0 = arith.constant 0 : index
    %0 = memref.load %arg1[%c0, %c0_0] : memref<1x1xf32, #tpu.memory_space<smem>>
    %c0_1 = arith.constant 0 : index
    %c0_2 = arith.constant 0 : index
    %c0_3 = arith.constant 0 : index
    %1 = vector.load %arg2[%c0_1, %c0_2, %c0_3] : memref<4x128x128xf32, #tpu.memory_space<vmem>>, vector<4x128x128xf32>
    %c0_4 = arith.constant 0 : index
    %c0_5 = arith.constant 0 : index
    %c0_6 = arith.constant 0 : index
    %2 = vector.load %arg3[%c0_4, %c0_5, %c0_6] : memref<4x128x128xf32, #tpu.memory_space<vmem>>, vector<4x128x128xf32>
    %c0_7 = arith.constant 0 : index
    %c0_8 = arith.constant 0 : index
    %c0_9 = arith.constant 0 : index
    %3 = vector.load %arg4[%c0_7, %c0_8, %c0_9] : memref<4x128x128xf32, #tpu.memory_space<vmem>>, vector<4x128x128xf32>
    "tpu.trace_start"() <{level = 10 : i32, message = "bqd,bdk->bqk"}> : () -> ()
    %cst = arith.constant dense<0.000000e+00> : vector<4x128x128xf32>
    %4 = tpu.matmul %1, %2, %cst {dimension_numbers = #tpu.dot_dimension_numbers<[2], [1], [1], [2], [0, 0, 0, 1, 1, 2], [0], [0]>} : vector<4x128x128xf32>, vector<4x128x128xf32>, vector<4x128x128xf32> -> vector<4x128x128xf32>
    "tpu.trace_stop"() : () -> ()
    %5 = vector.broadcast %0 : f32 to vector<4x128x128xf32>
    %6 = arith.mulf %4, %5 : vector<4x128x128xf32>
    %cst_10 = arith.constant dense<0xFF800000> : vector<4x128xf32>
    %7 = vector.multi_reduction <maximumf>, %6, %cst_10 [2] : vector<4x128x128xf32> to vector<4x128xf32>
    %8 = vector.shape_cast %7 : vector<4x128xf32> to vector<4x128x1xf32>
    %9 = vector.broadcast %8 : vector<4x128x1xf32> to vector<4x128x128xf32>
    %10 = arith.subf %6, %9 : vector<4x128x128xf32>
    %11 = math.exp %10 : vector<4x128x128xf32>
    %cst_11 = arith.constant dense<0.000000e+00> : vector<4x128xf32>
    %12 = vector.multi_reduction <add>, %11, %cst_11 [2] : vector<4x128x128xf32> to vector<4x128xf32>
    %13 = vector.shape_cast %12 : vector<4x128xf32> to vector<4x128x1xf32>
    %14 = tpu.reciprocal %13 {approx = true} : vector<4x128x1xf32> -> vector<4x128x1xf32>
    %15 = vector.broadcast %14 : vector<4x128x1xf32> to vector<4x128x128xf32>
    %16 = arith.mulf %11, %15 : vector<4x128x128xf32>
    "tpu.trace_start"() <{level = 10 : i32, message = "bqk,bkd->bqd"}> : () -> ()
    %cst_12 = arith.constant dense<0.000000e+00> : vector<4x128x128xf32>
    %17 = tpu.matmul %16, %3, %cst_12 {dimension_numbers = #tpu.dot_dimension_numbers<[2], [1], [1], [2], [0, 0, 0, 1, 1, 2], [0], [0]>} : vector<4x128x128xf32>, vector<4x128x128xf32>, vector<4x128x128xf32> -> vector<4x128x128xf32>
    "tpu.trace_stop"() : () -> ()
    %c0_13 = arith.constant 0 : index
    %c0_14 = arith.constant 0 : index
    %c0_15 = arith.constant 0 : index
    %18 = vector.load %arg5[%c0_13, %c0_14, %c0_15] : memref<4x128x128xf32, #tpu.memory_space<vmem>>, vector<4x128x128xf32>
    tpu.vector_store %arg5[%c0_13, %c0_14, %c0_15], %17 {strides = array<i32>} : memref<4x128x128xf32, #tpu.memory_space<vmem>>, vector<4x128x128xf32>,
    %c0_16 = arith.constant 0 : index
    %c0_17 = arith.constant 0 : index
    %c0_18 = arith.constant 0 : index
    %19 = vector.load %arg6[%c0_16, %c0_17, %c0_18] : memref<4x128x128xf32, #tpu.memory_space<vmem>>, vector<4x128x128xf32>
    tpu.vector_store %arg6[%c0_16, %c0_17, %c0_18], %16 {strides = array<i32>} : memref<4x128x128xf32, #tpu.memory_space<vmem>>, vector<4x128x128xf32>,
    return
  }
  func.func @transform_0(%arg0: i32) -> (i32, i32) {
    %c0_i32 = arith.constant 0 : i32
    %c0_i32_0 = arith.constant 0 : i32
    %c0_i32_1 = arith.constant 0 : i32
    return %c0_i32, %c0_i32_0 : i32, i32
  }
  func.func @transform_1(%arg0: i32) -> (i32, i32, i32) {
    %c0_i32 = arith.constant 0 : i32
    %c0_i32_0 = arith.constant 0 : i32
    %c0_i32_1 = arith.constant 0 : i32
    return %arg0, %c0_i32, %c0_i32_0 : i32, i32, i32
  }
  func.func @transform_2(%arg0: i32) -> (i32, i32, i32) {
    %c0_i32 = arith.constant 0 : i32
    %c0_i32_0 = arith.constant 0 : i32
    %c0_i32_1 = arith.constant 0 : i32
    return %arg0, %c0_i32, %c0_i32_0 : i32, i32, i32
  }
  func.func @transform_3(%arg0: i32) -> (i32, i32, i32) {
    %c0_i32 = arith.constant 0 : i32
    %c0_i32_0 = arith.constant 0 : i32
    %c0_i32_1 = arith.constant 0 : i32
    return %arg0, %c0_i32, %c0_i32_0 : i32, i32, i32
  }
  func.func @transform_4(%arg0: i32) -> (i32, i32, i32) {
    %c0_i32 = arith.constant 0 : i32
    %c0_i32_0 = arith.constant 0 : i32
    %c0_i32_1 = arith.constant 0 : i32
    return %arg0, %c0_i32, %c0_i32_0 : i32, i32, i32
  }
  func.func @transform_5(%arg0: i32) -> (i32, i32, i32) {
    %c0_i32 = arith.constant 0 : i32
    %c0_i32_0 = arith.constant 0 : i32
    %c0_i32_1 = arith.constant 0 : i32
    return %arg0, %c0_i32, %c0_i32_0 : i32, i32, i32
  }
}

</mosaic_0001>

<bundles_post_ra>
// kernel: tpu_custom_call.1
= control target key start
LH: loop header
LB: loop body
LE: loop exit
PB: predicated region body
PF: predicated region fallthrough
CT: control target
= control target key end

     0   :  { %s5444_s0 = inlined_call_operand.<no memory space> [shape: f32[1,1], index: 0, kind: input, shape index: {}]   ;;  %s5445_s1 = inlined_call_operand.hbm [shape: f32[8,128,128], index: 1, kind: input, shape index: {}]   ;;  %s5446_s2 = inlined_call_operand.hbm [shape: f32[8,128,128], index: 2, kind: input, shape index: {}]   ;;  %s5447_s3 = inlined_call_operand.hbm [shape: f32[8,128,128], index: 3, kind: input, shape index: {}]   ;;  %s5448_s4 = inlined_call_operand.hbm [shape: f32[8,128,128], index: 4, kind: output, shape index: {0}]   ;;  %s5449_s5 = inlined_call_operand.hbm [shape: f32[8,128,128], index: 5, kind: output, shape index: {1}]  }
   0x1   :  { %5488 = sst [smem:[#allocation34_spill]] %s5445_s1 }
   0x2   :  { %5489 = sst [smem:[#allocation35_spill]] %s5446_s2 }
   0x3   :  { %11 = sst [smem:[#allocation2]] %s5444_s0 }
   0x4   :  { %12 = vsyncpa [#allocation4], 0 }
   0x5   :  { %14 = vsyncpa [#allocation4 + $0x1], 0 }
   0x6   :  { %15 = vsyncpa [#allocation7], 0 }
   0x7   :  { %17 = vsyncpa [#allocation7 + $0x1], 0 }
   0x8   :  { %18 = vsyncpa [#allocation5], 0 }
   0x9   :  { %20 = vsyncpa [#allocation5 + $0x1], 0 }
   0xa   :  { %21 = vsyncpa [#allocation11], 0 }
   0xb   :  { %23 = vsyncpa [#allocation11 + $0x1], 0  ;;  %s4205_s20 = smov 0   ;;  %s4207_s21 = smov 0  }
   0xc   :  { %s4209_s22 = smov 0   ;;  %s4211_s23 = smov 0  }
   0xd LB: > { %s4226_s0 = sadd.s32 4294967295, %s4161_s23   ;;  %s2647_s24 = sadd.s32 4294967294, %s4161_s23   ;;  %s4161_s23 = sphi %s4211_s23, %s5573_s23   ;;  %s4157_s22 = sphi %s4209_s22, %s5572_s22   ;;  %s4153_s21 = sphi %s4207_s21, %s5571_s21   ;;  %s4149_s20 = sphi %s4205_s20, %s5570_s20  }
   0xe   : > { %s4230_s25 = sadd.s32 1, %s4161_s23   ;;  %s57_s26 = sadd.s32 1, %s4157_s22 }
   0xf   : > { %s54_s27 = ssub.s32 %s4161_s23, %s4230_s25  ;;  %p64_p0 = scmp.ne.s32.totalorder %s4157_s22, %s4153_s21 }
  0x10   : > { %p55_p1 = scmp.eq.s32.totalorder %s54_s27, 0  ;;  %p65_p2 = scmp.eq.s32.totalorder %s4161_s23, 0 }
  0x11   : > { %p70_p3 = scmp.ne.s32.totalorder %s4153_s21, %s4149_s20  ;;  %p71_p4 = scmp.eq.s32.totalorder %s4226_s0, 0 }
  0x12   : > { %s4242_s28 = scalar_select %p55_p1, %s4157_s22, %s57_s26  }
  0x13   : > { %p66_p5 = por %p65_p2, %p64_p0  ;;  %p4244_p6 = por %p71_p4, %p70_p3 }
  0x14   : > { %p146_p7 = scmp.eq.s32.totalorder %s4226_s0, 1  ;;  %p152_p8 = scmp.eq.s32.totalorder %s2647_s24, 1 }
  0x15   : > { %s5490_s29 = scalar_select %p4244_p6, 1, 0 }
  0x16   : > { %p3675_p10 = scmp.lt.s32.totalorder %s4161_s23, 2  ;;  %p4251_p11 = por %p146_p7, %p64_p0 }
  0x17   : > { %p4255_p12 = por %p152_p8, %p70_p3  ;;  %s201_s7 = sand.u32 1, %s4157_s22  }
  0x18   : > { %s5491_s30 = scalar_select %p4251_p11, 1, 0 }
  0x19   : > { %s5492_s6 = scalar_select %p4255_p12, 1, 0 }
  0x1a   : > { %s4261_s8 = sshll.u32 %s4161_s23, 13  ;;  %s4265_s9 = sshll.u32 %s201_s7, 9 }
  0x1b   : > { %p4267_p13 = pnand %p3675_p10, %p66_p5  ;;  %s223_s11 = sand.u32 1, %s4161_s23  }
  0x1c   : > { %s5494_s2 = sld [smem:[#allocation35_spill]]  ;;  %s227_s15 = scalar_lea.vmem [#allocation6], %s4265_s9 }
  0x1d   : > { %s235_s16 = sshll.u32 %s227_s15, 4  ;;  %s4282_s17 = scalar_lea.sflag [#allocation7], %s223_s11  ;;  %s4279_s16 = int_to_ptr.vmem [resolvable:$true] %s235_s16 }
  0x1e   : > { %p4288_p2 = pneg %p4267_p13 }
  0x22   : > { %s4276_s14 = scalar_lea.hbm %s5494_s2, %s4261_s8  ;;  %s3974_s27 = scalar_lea.hbm %s5494_s2, 16384 }
  0x23   : > { %s3969_s18 = scalar_lea.hbm %s4276_s14, 8192  ;;  %p3975_p5 = scmp.lt.u32.totalorder %s4276_s14, %s5494_s2 }
  0x24   : > { %p3970_p1 = scmp.ne.s32.totalorder %s4276_s14, %s3969_s18  ;;  %p3976_p7 = scmp.lt.u32.totalorder %s3974_s27, %s3969_s18 }
  0x25   : > { %p3978_p10 = scmp.lt.u32.totalorder %s3969_s18, %s4276_s14 }
  0x26   : > { %p3972_p3 = pnand %p4288_p2, %p3970_p1  ;;  %p3977_p8 = por %p3976_p7, %p3975_p5 }
  0x28   : > { %p3973_p4 = pneg %p3972_p3  ;;  %p3979_p9 = por %p3978_p10, %p3977_p8 }
  0x2a   : > { %p3980_p0 = pnand %p3979_p9, %p3973_p4 }
  0x2c   : > { %3983 = shalt.err (!%p3980_p0)
}
  0x2d   : > { %s3984_s11 = scalar_lea.vmem %s4279_s16, 8192  ;;  %s4163_s15 = smov [#allocation6]  }
  0x2e   : > { %p3985_p1 = scmp.ne.s32.totalorder %s4279_s16, %s3984_s11  ;;  %s3989_s24 = sshll.u32 %s4163_s15, 4  ;;  %s3990_s24 = int_to_ptr.vmem [resolvable:$false] %s3989_s24 }
  0x2f   : > { %s3991_s26 = scalar_lea.vmem %s3990_s24, 16384  ;;  %p3992_p11 = scmp.lt.s32.totalorder %s4279_s16, %s3990_s24 }
  0x30   : > { %p3987_p3 = pnand %p3985_p1, %p4288_p2  ;;  %p3993_p6 = scmp.lt.s32.totalorder %s3991_s26, %s3984_s11 }
  0x32   : > { %p3988_p12 = pneg %p3987_p3  ;;  %p3994_p5 = por %p3993_p6, %p3992_p11 }
  0x34   : > { %p3995_p7 = pnand %p3994_p5, %p3988_p12 }
  0x36   : > { %3998 = shalt.err (!%p3995_p7)
}
  0x37   : > { %s5452_s18 = smov 128   ;;  %s5454_s27 = smov 8  }
  0x38   : > { %3664 = dma.hbm_to_vmem [thread:$0]  (!%p4267_p13), %s4276_s14, 8192, %s4279_s16, %s4282_s17, %s5452_s18, %s5452_s18, %s5454_s27  }
  0x39   : > { %p265_p6 = scmp.lt.s32.totalorder %s4161_s23, 3  ;;  %s5496_s1 = sld [smem:[#allocation34_spill]] }
  0x3a   : > { %p5497_p9 = scmp.ge.s32.totalorder %s4161_s23, 1  ;;  %s205_s24 = scalar_lea.vmem [#allocation3], %s4265_s9 }
  0x3b   : > { %s213_s26 = sshll.u32 %s205_s24, 4  ;;  %s4333_s14 = scalar_lea.sflag [#allocation4], %s201_s7  ;;  %s4329_s26 = int_to_ptr.vmem [resolvable:$true] %s213_s26 }
  0x3c   : > { %p4324_p11 = pnand %p5497_p9, %p265_p6 }
  0x3e   : > { %s5498_s15 = scalar_select %p4324_p11, 1, 0 }
  0x3f   : > { %s4320_s11 = scalar_lea.hbm %s5496_s1, %s4261_s8  ;;  %s4004_s18 = scalar_lea.hbm %s5496_s1, 16384 }
  0x40   : > { %s3999_s16 = scalar_lea.hbm %s4320_s11, 8192  ;;  %p4005_p8 = scmp.lt.u32.totalorder %s4320_s11, %s5496_s1 }
  0x41   : > { %p4000_p12 = scmp.ne.s32.totalorder %s4320_s11, %s3999_s16  ;;  %p4006_p10 = scmp.lt.u32.totalorder %s4004_s18, %s3999_s16 }
  0x42   : > { %p4008_p3 = scmp.lt.u32.totalorder %s3999_s16, %s4320_s11 }
  0x43   : > { %p4002_p0 = pnand %p4000_p12, %p4288_p2  ;;  %p4007_p1 = por %p4006_p10, %p4005_p8 }
  0x45   : > { %p4003_p4 = pneg %p4002_p0  ;;  %p4009_p5 = por %p4008_p3, %p4007_p1 }
  0x47   : > { %p4010_p7 = pnand %p4009_p5, %p4003_p4 }
  0x49   : > { %4013 = shalt.err (!%p4010_p7)
}
  0x4a   : > { %s4014_s7 = scalar_lea.vmem %s4329_s26, 8192  ;;  %s4166_s24 = smov [#allocation3]  }
  0x4b   : > { %p4015_p6 = scmp.ne.s32.totalorder %s4329_s26, %s4014_s7  ;;  %s4019_s12 = sshll.u32 %s4166_s24, 4  ;;  %s4020_s12 = int_to_ptr.vmem [resolvable:$false] %s4019_s12 }
  0x4c   : > { %s4021_s2 = scalar_lea.vmem %s4020_s12, 16384  ;;  %p4022_p0 = scmp.lt.s32.totalorder %s4329_s26, %s4020_s12 }
  0x4d   : > { %p4017_p9 = pnand %p4015_p6, %p4288_p2  ;;  %p4023_p11 = scmp.lt.s32.totalorder %s4021_s2, %s4014_s7 }
  0x4f   : > { %p4018_p12 = pneg %p4017_p9  ;;  %p4024_p8 = por %p4023_p11, %p4022_p0 }
  0x51   : > { %p4025_p10 = pnand %p4024_p8, %p4018_p12 }
  0x53   : > { %4028 = shalt.err (!%p4025_p10)
}
  0x54   : > { %s5499_s18 = smov 8   ;;  %s5500_s27 = smov 128  }
  0x55   : > { %3661 = dma.hbm_to_vmem [thread:$0]  (!%p4267_p13), %s4320_s11, 8192, %s4329_s26, %s4333_s14, %s5500_s27, %s5500_s27, %s5499_s18  }
  0x56   : > { %s4364_s24 = scalar_lea.hbm %s5447_s3, %s4261_s8  ;;  %s249_s7 = scalar_lea.vmem [#allocation8], %s4265_s9 }
  0x57   : > { %s257_s12 = sshll.u32 %s249_s7, 4  ;;  %s4029_s2 = scalar_lea.hbm %s4364_s24, 8192  ;;  %s4367_s12 = int_to_ptr.vmem [resolvable:$true] %s257_s12 }
  0x58   : > { %p4030_p11 = scmp.ne.s32.totalorder %s4364_s24, %s4029_s2  ;;  %s4034_s26 = scalar_lea.hbm %s5447_s3, 16384 }
  0x59   : > { %p4035_p3 = scmp.lt.u32.totalorder %s4364_s24, %s5447_s3  ;;  %p4036_p5 = scmp.lt.u32.totalorder %s4034_s26, %s4029_s2 }
  0x5a   : > { %p4032_p4 = pnand %p4030_p11, %p4288_p2  ;;  %p4038_p6 = scmp.lt.u32.totalorder %s4029_s2, %s4364_s24 }
  0x5b   : > { %p4037_p7 = por %p4036_p5, %p4035_p3 }
  0x5c   : > { %p4033_p1 = pneg %p4032_p4 }
  0x5d   : > { %p4039_p9 = por %p4038_p6, %p4037_p7 }
  0x5f   : > { %p4040_p12 = pnand %p4039_p9, %p4033_p1 }
  0x61   : > { %4043 = shalt.err (!%p4040_p12)
}
  0x62   : > { %s4044_s9 = scalar_lea.vmem %s4367_s12, 8192  ;;  %s4167_s1 = smov [#allocation8]  }
  0x63   : > { %p4045_p0 = scmp.ne.s32.totalorder %s4367_s12, %s4044_s9  ;;  %s4049_s16 = sshll.u32 %s4167_s1, 4  ;;  %s4050_s16 = int_to_ptr.vmem [resolvable:$false] %s4049_s16 }
  0x64   : > { %s4051_s13 = scalar_lea.vmem %s4050_s16, 16384  ;;  %p4052_p11 = scmp.lt.s32.totalorder %s4367_s12, %s4050_s16 }
  0x65   : > { %p4047_p8 = pnand %p4045_p0, %p4288_p2  ;;  %p4053_p4 = scmp.lt.s32.totalorder %s4051_s13, %s4044_s9 }
  0x67   : > { %p4048_p10 = pneg %p4047_p8  ;;  %p4054_p3 = por %p4053_p4, %p4052_p11 }
  0x69   : > { %p4055_p5 = pnand %p4054_p3, %p4048_p10 }
  0x6b   : > { %4058 = shalt.err (!%p4055_p5)
}
  0x6c   : > { %3667 = dma.hbm_to_vmem [thread:$0]  (!%p4267_p13), %s4364_s24, 8192, %s4367_s12, %s4282_s17, %s5500_s27, %s5500_s27, %s5499_s18  }
  0x6d   : > { %p5501_p2 = scmp.ne.s32.totalorder %s5498_s15, 0 }
  0x6f   : > { %269 = sbr.rel (%p5501_p2) target bundleno = 1042 (0x412), region = 36 }
  0x76   : > { %s4397_s19 = sand.u32 1, %s4153_s21   ;;  %p5502_p1 = scmp.ne.s32.totalorder %s5490_s29, 0 }
  0x77   : > { %s4400_s7 = sshll.u32 %s4397_s19, 9  ;;  %s272_s10 = scalar_lea.sflag [#allocation4], %s4397_s19 }
  0x78   : > { %s4404_s2 = scalar_lea.vmem [#allocation3], %s4400_s7 }
  0x79   : > { %4132 = dma.done.wait (%p5502_p1), %s272_s10, 8192  }
  0x7a   : > { %4134 = vsyncadd (%p5502_p1), %s272_s10, 4294959104  ;;  %s280_s17 = sand.u32 1, %s4226_s0   ;;  %s4412_s18 = scalar_lea.vmem [#allocation6], %s4400_s7 }
  0x7b   : > { %s281_s15 = scalar_lea.sflag [#allocation7], %s280_s17 }
  0x7c   : > { %4136 = dma.done.wait (%p5502_p1), %s281_s15, 16384  }
  0x7d   : > { %4138 = vsyncadd (%p5502_p1), %s281_s15, 4294950912  ;;  %v405_v0 = vld [vmem:[%s4412_s18] sm:$0xff]  ;;  %v406_v1 = vld [vmem:[%s4412_s18 + $0x8] sm:$0xff]  ;;  %s340_s29 = sld [smem:[#allocation2]]  ;;  %s4830_s27 = scalar_lea.vmem [#allocation8], %s4400_s7 }
  0x7e   : > { %v421_v2 = vld [vmem:[%s4412_s18 + $0x80] sm:$0xff]  ;;  %v3392_v3 = vpack.c.bf16 %v406_v1, %v405_v0  ;;  %v422_v4 = vld [vmem:[%s4412_s18 + $0x88] sm:$0xff]  ;;  %v407_v5 = vld [vmem:[%s4412_s18 + $0x10] sm:$0xff]  ;;  %s5125_s24 = scalar_lea.vmem [#allocation10], %s4400_s7  ;;  %s2685_s12 = sshll.u32 %s4226_s0, 13 }
  0x7f   : > { %v408_v6 = vld [vmem:[%s4412_s18 + $0x18] sm:$0xff]  ;;  %v3424_v7 = vpack.c.bf16 %v422_v4, %v421_v2  ;;  %v423_v9 = vld [vmem:[%s4412_s18 + $0x90] sm:$0xff]  ;;  %v409_v11 = vld [vmem:[%s4412_s18 + $0x20] sm:$0xff]  ;;  %s5286_s11 = scalar_lea.vmem [#allocation9], %s4400_s7  ;;  %s5294_s8 = scalar_lea.hbm %s5449_s5, %s2685_s12 }
  0x80   : > { %v3396_v8 = vpack.c.bf16 %v408_v6, %v407_v5  ;;  %v424_v10 = vld [vmem:[%s4412_s18 + $0x98] sm:$0xff]  ;;  %3393 = vmatprep.subr.bf16.mxu0 %v3392_v3  ;;  %v410_v13 = vld [vmem:[%s4412_s18 + $0x28] sm:$0xff]  ;;  %v425_v14 = vld [vmem:[%s4412_s18 + $0xa0] sm:$0xff]  ;;  %s2499_s9 = sshll.u32 %s5125_s24, 4  ;;  %s2468_s1 = scalar_lea.sflag [#allocation11], %s4397_s19  ;;  %s5298_s9 = int_to_ptr.vmem [resolvable:$true] %s2499_s9 }
  0x81   : > { %v3428_v12 = vpack.c.bf16 %v424_v10, %v423_v9  ;;  %v426_v15 = vld [vmem:[%s4412_s18 + $0xa8] sm:$0xff]  ;;  %3395 = vmatpush3.bf16.msra.mxu0 %v3392_v3  ;;  %3425 = vmatprep.subr.bf16.mxu1 %v3424_v7  ;;  %v3400_v16 = vpack.c.bf16 %v410_v13, %v409_v11  ;;  %v411_v18 = vld [vmem:[%s4412_s18 + $0x30] sm:$0xff]  ;;  %v412_v19 = vld [vmem:[%s4412_s18 + $0x38] sm:$0xff]  ;;  %s4059_s16 = scalar_lea.vmem %s5298_s9, 8192  ;;  %p5567_p7 = scmp.ne.s32.totalorder %s5491_s30, 0 }
  0x82   : > { %3397 = vmatprep.subr.bf16.mxu0 %v3396_v8  ;;  %3427 = vmatpush3.bf16.msra.mxu1 %v3424_v7  ;;  %v3432_v17 = vpack.c.bf16 %v426_v15, %v425_v14  ;;  %v427_v20 = vld [vmem:[%s4412_s18 + $0xb0] sm:$0xff]  ;;  %v428_v21 = vld [vmem:[%s4412_s18 + $0xb8] sm:$0xff]  ;;  %v3404_v22 = vpack.c.bf16 %v412_v19, %v411_v18  ;;  %v413_v24 = vld [vmem:[%s4412_s18 + $0x40] sm:$0xff]  ;;  %p4060_p13 = scmp.ne.s32.totalorder %s5298_s9, %s4059_s16  ;;  %s4168_s13 = smov [#allocation10]  }
  0x83   : > { %3429 = vmatprep.subr.bf16.mxu1 %v3428_v12  ;;  %v3436_v23 = vpack.c.bf16 %v428_v21, %v427_v20  ;;  %v414_v25 = vld [vmem:[%s4412_s18 + $0x48] sm:$0xff]  ;;  %v341_v26 = vld [vmem:[%s4404_s2] sm:$0xff]  ;;  %v415_v32 = vld [vmem:[%s4412_s18 + $0x50] sm:$0xff]  ;;  %s4063_s7 = sshll.u32 %s4168_s13, 4  ;;  %s4064_s7 = int_to_ptr.vmem [resolvable:$false] %s4063_s7 }
  0x84   : > { %v429_v27 = vld [vmem:[%s4412_s18 + $0xc0] sm:$0xff]  ;;  %v430_v28 = vld [vmem:[%s4412_s18 + $0xc8] sm:$0xff]  ;;  %2976 = vmatprep.mubr.f32.mxu0 %v341_v26  ;;  %v3408_v30 = vpack.c.bf16 %v414_v25, %v413_v24  ;;  %v416_v33 = vld [vmem:[%s4412_s18 + $0x58] sm:$0xff]  ;;  %p4061_p6 = pnand %p4060_p13, %p5567_p7  ;;  %s4065_s10 = scalar_lea.vmem %s4064_s7, 16384 }
  0x85   : > { %3399 = vmatpush3.bf16.msra.mxu0 %v3396_v8  ;;  %v357_v29 = vld [vmem:[%s4404_s2 + $0x80] sm:$0xff]  ;;  %v3440_v31 = vpack.c.bf16 %v430_v28, %v429_v27  ;;  %v431_v34 = vld [vmem:[%s4412_s18 + $0xd0] sm:$0xff]  ;;  %v432_v35 = vld [vmem:[%s4412_s18 + $0xd8] sm:$0xff]  ;;  %v3412_v36 = vpack.c.bf16 %v416_v33, %v415_v32  ;;  %p4066_p12 = scmp.lt.s32.totalorder %s5298_s9, %s4064_s7  ;;  %p4067_p0 = scmp.lt.s32.totalorder %s4065_s10, %s4059_s16 }
  0x86   : > { %3401 = vmatprep.subr.bf16.mxu0 %v3400_v16  ;;  %3431 = vmatpush3.bf16.msra.mxu1 %v3428_v12  ;;  %v3444_v37 = vpack.c.bf16 %v432_v35, %v431_v34  ;;  %v417_v38 = vld [vmem:[%s4412_s18 + $0x60] sm:$0xff]  ;;  %v418_v39 = vld [vmem:[%s4412_s18 + $0x68] sm:$0xff]  ;;  %v419_v44 = vld [vmem:[%s4412_s18 + $0x70] sm:$0xff]  ;;  %p4062_p9 = pneg %p4061_p6 }
  0x87   : > { %3433 = vmatprep.subr.bf16.mxu1 %v3432_v17  ;;  %3032 = vmatprep.mubr.f32.mxu1 %v357_v29  ;;  %v433_v40 = vld [vmem:[%s4412_s18 + $0xe0] sm:$0xff]  ;;  %v434_v41 = vld [vmem:[%s4412_s18 + $0xe8] sm:$0xff]  ;;  %v3416_v42 = vpack.c.bf16 %v418_v39, %v417_v38  ;;  %v420_v45 = vld [vmem:[%s4412_s18 + $0x78] sm:$0xff]  ;;  %p4068_p8 = por %p4067_p0, %p4066_p12 }
  0x88   : > { %v3448_v43 = vpack.c.bf16 %v434_v41, %v433_v40  ;;  %v435_v46 = vld [vmem:[%s4412_s18 + $0xf0] sm:$0xff]  ;;  %v436_v47 = vld [vmem:[%s4412_s18 + $0xf8] sm:$0xff]  ;;  %v3420_v48 = vpack.c.bf16 %v420_v45, %v419_v44  ;;  %v437_v50 = vld [vmem:[%s4412_s18 + $0x100] sm:$0xff] }
  0x89   : > { %3403 = vmatpush3.bf16.msra.mxu0 %v3400_v16  ;;  %v3452_v49 = vpack.c.bf16 %v436_v47, %v435_v46  ;;  %v438_v51 = vld [vmem:[%s4412_s18 + $0x108] sm:$0xff]  ;;  %v453_v52 = vld [vmem:[%s4412_s18 + $0x180] sm:$0xff]  ;;  %v439_v56 = vld [vmem:[%s4412_s18 + $0x110] sm:$0xff]  ;;  %p4069_p10 = pnand %p4068_p8, %p4062_p9 }
  0x8a   : > { %3405 = vmatprep.subr.bf16.mxu0 %v3404_v22  ;;  %3435 = vmatpush3.bf16.msra.mxu1 %v3432_v17  ;;  %v454_v53 = vld [vmem:[%s4412_s18 + $0x188] sm:$0xff]  ;;  %v3456_v54 = vpack.c.bf16 %v438_v51, %v437_v50  ;;  %v440_v57 = vld [vmem:[%s4412_s18 + $0x118] sm:$0xff]  ;;  %v455_v59 = vld [vmem:[%s4412_s18 + $0x190] sm:$0xff] }
  0x8b   : > { %3437 = vmatprep.subr.bf16.mxu1 %v3436_v23  ;;  %v3488_v55 = vpack.c.bf16 %v454_v53, %v453_v52  ;;  %v342_v58 = vld [vmem:[%s4404_s2 + $0x8] sm:$0xff]  ;;  %v456_v60 = vld [vmem:[%s4412_s18 + $0x198] sm:$0xff]  ;;  %v343_v62 = vld [vmem:[%s4404_s2 + $0x10] sm:$0xff]  ;;  %v3460_v0 = vpack.c.bf16 %v440_v57, %v439_v56 }
  0x8c   : > { %v358_v61 = vld [vmem:[%s4404_s2 + $0x88] sm:$0xff]  ;;  %v359_v63 = vld [vmem:[%s4404_s2 + $0x90] sm:$0xff]  ;;  %v3492_v1 = vpack.c.bf16 %v456_v60, %v455_v59  ;;  %v441_v2 = vld [vmem:[%s4412_s18 + $0x120] sm:$0xff] }
  0x8d   : > { %3407 = vmatpush3.bf16.msra.mxu0 %v3404_v22  ;;  %v442_v3 = vld [vmem:[%s4412_s18 + $0x128] sm:$0xff]  ;;  %v344_v4 = vld [vmem:[%s4404_s2 + $0x18] sm:$0xff]  ;;  %v457_v5 = vld [vmem:[%s4412_s18 + $0x1a0] sm:$0xff] }
  0x8e   : > { %3409 = vmatprep.subr.bf16.mxu0 %v3408_v30  ;;  %3439 = vmatpush3.bf16.msra.mxu1 %v3436_v23  ;;  %v458_v6 = vld [vmem:[%s4412_s18 + $0x1a8] sm:$0xff]  ;;  %v360_v7 = vld [vmem:[%s4404_s2 + $0x98] sm:$0xff]  ;;  %v345_v8 = vld [vmem:[%s4404_s2 + $0x20] sm:$0xff]  ;;  %v3464_v10 = vpack.c.bf16 %v442_v3, %v441_v2 }
  0x8f   : > { %3441 = vmatprep.subr.bf16.mxu1 %v3440_v31  ;;  %v361_v9 = vld [vmem:[%s4404_s2 + $0xa0] sm:$0xff]  ;;  %v3496_v11 = vpack.c.bf16 %v458_v6, %v457_v5  ;;  %v443_v12 = vld [vmem:[%s4412_s18 + $0x130] sm:$0xff]  ;;  %v444_v13 = vld [vmem:[%s4412_s18 + $0x138] sm:$0xff] }
  0x90   : > { %v346_v14 = vld [vmem:[%s4404_s2 + $0x28] sm:$0xff]  ;;  %v459_v15 = vld [vmem:[%s4412_s18 + $0x1b0] sm:$0xff]  ;;  %v460_v16 = vld [vmem:[%s4412_s18 + $0x1b8] sm:$0xff]  ;;  %v3468_v20 = vpack.c.bf16 %v444_v13, %v443_v12 }
  0x91   : > { %3411 = vmatpush3.bf16.msra.mxu0 %v3408_v30  ;;  %v362_v17 = vld [vmem:[%s4404_s2 + $0xa8] sm:$0xff]  ;;  %v347_v18 = vld [vmem:[%s4404_s2 + $0x30] sm:$0xff]  ;;  %v3500_v21 = vpack.c.bf16 %v460_v16, %v459_v15  ;;  %v445_v22 = vld [vmem:[%s4412_s18 + $0x140] sm:$0xff] }
  0x92   : > { %3413 = vmatprep.subr.bf16.mxu0 %v3412_v36  ;;  %3443 = vmatpush3.bf16.msra.mxu1 %v3440_v31  ;;  %v363_v19 = vld [vmem:[%s4404_s2 + $0xb0] sm:$0xff]  ;;  %v446_v23 = vld [vmem:[%s4412_s18 + $0x148] sm:$0xff]  ;;  %v348_v24 = vld [vmem:[%s4404_s2 + $0x38] sm:$0xff] }
  0x93   : > { %3445 = vmatprep.subr.bf16.mxu1 %v3444_v37  ;;  %v461_v25 = vld [vmem:[%s4412_s18 + $0x1c0] sm:$0xff]  ;;  %v462_v26 = vld [vmem:[%s4412_s18 + $0x1c8] sm:$0xff]  ;;  %v364_v27 = vld [vmem:[%s4404_s2 + $0xb8] sm:$0xff]  ;;  %v3472_v30 = vpack.c.bf16 %v446_v23, %v445_v22 }
  0x94   : > { %v349_v28 = vld [vmem:[%s4404_s2 + $0x40] sm:$0xff]  ;;  %v3504_v31 = vpack.c.bf16 %v462_v26, %v461_v25  ;;  %v447_v32 = vld [vmem:[%s4412_s18 + $0x150] sm:$0xff]  ;;  %v448_v33 = vld [vmem:[%s4412_s18 + $0x158] sm:$0xff] }
  0x95   : > { %3415 = vmatpush3.bf16.msra.mxu0 %v3412_v36  ;;  %v365_v29 = vld [vmem:[%s4404_s2 + $0xc0] sm:$0xff]  ;;  %v350_v34 = vld [vmem:[%s4404_s2 + $0x48] sm:$0xff]  ;;  %v463_v35 = vld [vmem:[%s4412_s18 + $0x1d0] sm:$0xff]  ;;  %v3476_v40 = vpack.c.bf16 %v448_v33, %v447_v32  ;;  %v4546_v32 = vstv %s340_s29 }
  0x96   : > { %3417 = vmatprep.subr.bf16.mxu0 %v3416_v42  ;;  %3447 = vmatpush3.bf16.msra.mxu1 %v3444_v37  ;;  %v464_v36 = vld [vmem:[%s4412_s18 + $0x1d8] sm:$0xff]  ;;  %v366_v37 = vld [vmem:[%s4404_s2 + $0xc8] sm:$0xff]  ;;  %v351_v38 = vld [vmem:[%s4404_s2 + $0x50] sm:$0xff] }
  0x97   : > { %3449 = vmatprep.subr.bf16.mxu1 %v3448_v43  ;;  %v367_v39 = vld [vmem:[%s4404_s2 + $0xd0] sm:$0xff]  ;;  %v3508_v41 = vpack.c.bf16 %v464_v36, %v463_v35  ;;  %v352_v44 = vld [vmem:[%s4404_s2 + $0x58] sm:$0xff]  ;;  %v465_v45 = vld [vmem:[%s4412_s18 + $0x1e0] sm:$0xff] }
  0x98   : > { %v466_v46 = vld [vmem:[%s4412_s18 + $0x1e8] sm:$0xff]  ;;  %v368_v47 = vld [vmem:[%s4404_s2 + $0xd8] sm:$0xff]  ;;  %v451_v52 = vld [vmem:[%s4412_s18 + $0x170] sm:$0xff] }
  0x99   : > { %3419 = vmatpush3.bf16.msra.mxu0 %v3416_v42  ;;  %v449_v42 = vld [vmem:[%s4412_s18 + $0x160] sm:$0xff]  ;;  %v3512_v51 = vpack.c.bf16 %v466_v46, %v465_v45  ;;  %v452_v53 = vld [vmem:[%s4412_s18 + $0x178] sm:$0xff]  ;;  %v370_v57 = vld [vmem:[%s4404_s2 + $0xe8] sm:$0xff] }
  0x9a   : > { %3421 = vmatprep.subr.bf16.mxu0 %v3420_v48  ;;  %3451 = vmatpush3.bf16.msra.mxu1 %v3448_v43  ;;  %v450_v43 = vld [vmem:[%s4412_s18 + $0x168] sm:$0xff]  ;;  %v468_v56 = vld [vmem:[%s4412_s18 + $0x1f8] sm:$0xff]  ;;  %v371_v59 = vld [vmem:[%s4404_s2 + $0xf0] sm:$0xff]  ;;  %v3484_v60 = vpack.c.bf16 %v452_v53, %v451_v52 }
  0x9b   : > { %3453 = vmatprep.subr.bf16.mxu1 %v3452_v49  ;;  %v3480_v50 = vpack.c.bf16 %v450_v43, %v449_v42  ;;  %v374_v2 = vld [vmem:[%s4404_s2 + $0x108] sm:$0xff]  ;;  %v391_v5 = vld [vmem:[%s4404_s2 + $0x190] sm:$0xff]  ;;  %v376_v6 = vld [vmem:[%s4404_s2 + $0x118] sm:$0xff] }
  0x9c   : > { %v390_v3 = vld [vmem:[%s4404_s2 + $0x188] sm:$0xff]  ;;  %v379_v12 = vld [vmem:[%s4404_s2 + $0x130] sm:$0xff]  ;;  %v396_v15 = vld [vmem:[%s4404_s2 + $0x1b8] sm:$0xff] }
  0x9d   : > { %3423 = vmatpush3.bf16.msra.mxu0 %v3420_v48  ;;  %v353_v48 = vld [vmem:[%s4404_s2 + $0x60] sm:$0xff]  ;;  %v395_v13 = vld [vmem:[%s4404_s2 + $0x1b0] sm:$0xff]  ;;  %v384_v22 = vld [vmem:[%s4404_s2 + $0x158] sm:$0xff] }
  0x9e   : > { %3455 = vmatpush3.bf16.msra.mxu1 %v3452_v49  ;;  %3457 = vmatprep.subr.bf16.mxu0 %v3456_v54  ;;  %v369_v49 = vld [vmem:[%s4404_s2 + $0xe0] sm:$0xff]  ;;  %v400_v23 = vld [vmem:[%s4404_s2 + $0x1d8] sm:$0xff]  ;;  %v386_v26 = vld [vmem:[%s4404_s2 + $0x168] sm:$0xff] }
  0x9f   : > { %3489 = vmatprep.subr.bf16.mxu1 %v3488_v55  ;;  %v381_v16 = vld [vmem:[%s4404_s2 + $0x140] sm:$0xff] }
  0xa0   : > { %2977 = vmatmul.mubr.f32.vlgmr.msra.gmra.mrb[0].mxu0 %v342_v58  ;;  %v355_v58 = vld [vmem:[%s4404_s2 + $0x70] sm:$0xff]  ;;  %v401_v25 = vld [vmem:[%s4404_s2 + $0x1e0] sm:$0xff] }
  0xa1   : > { %3033 = vmatmul.mubr.f32.vlgmr.msra.gmra.mrb[0].mxu1 %v358_v61  ;;  %2979 = vmatprep.mubr.f32.mxu0 %v343_v62  ;;  %v356_v62 = vld [vmem:[%s4404_s2 + $0x78] sm:$0xff] }
  0xa2   : > { %3035 = vmatprep.mubr.f32.mxu1 %v359_v63  ;;  %3459 = vmatpush3.bf16.msra.mxu0 %v3456_v54  ;;  %v354_v54 = vld [vmem:[%s4404_s2 + $0x68] sm:$0xff]  ;;  %v372_v63 = vld [vmem:[%s4404_s2 + $0xf8] sm:$0xff] }
  0xa3   : > { %3491 = vmatpush3.bf16.msra.mxu1 %v3488_v55  ;;  %3461 = vmatprep.subr.bf16.mxu0 %v3460_v0  ;;  %v467_v55 = vld [vmem:[%s4412_s18 + $0x1f0] sm:$0xff] }
  0xa4   : > { %2980 = vmatmul.mubr.f32.gmra.mrb[2].mxu0 %v344_v4  ;;  %3493 = vmatprep.subr.bf16.mxu1 %v3492_v1  ;;  %v3516_v61 = vpack.c.bf16 %v468_v56, %v467_v55  ;;  %v375_v4 = vld [vmem:[%s4404_s2 + $0x110] sm:$0xff] }
  0xa5   : > { %3036 = vmatmul.mubr.f32.gmra.mrb[2].mxu1 %v360_v7  ;;  %2982 = vmatprep.mubr.f32.mxu0 %v345_v8  ;;  %v392_v7 = vld [vmem:[%s4404_s2 + $0x198] sm:$0xff]  ;;  %v377_v8 = vld [vmem:[%s4404_s2 + $0x120] sm:$0xff] }
  0xa6   : > { %3038 = vmatprep.mubr.f32.mxu1 %v361_v9  ;;  %3463 = vmatpush3.bf16.msra.mxu0 %v3460_v0  ;;  %v373_v0 = vld [vmem:[%s4404_s2 + $0x100] sm:$0xff] }
  0xa7   : > { %3495 = vmatpush3.bf16.msra.mxu1 %v3492_v1  ;;  %3465 = vmatprep.subr.bf16.mxu0 %v3464_v10  ;;  %v389_v1 = vld [vmem:[%s4404_s2 + $0x180] sm:$0xff] }
  0xa8   : > { %2983 = vmatmul.mubr.f32.gmra.mrb[4].mxu0 %v346_v14  ;;  %3497 = vmatprep.subr.bf16.mxu1 %v3496_v11  ;;  %v393_v9 = vld [vmem:[%s4404_s2 + $0x1a0] sm:$0xff]  ;;  %v380_v14 = vld [vmem:[%s4404_s2 + $0x138] sm:$0xff] }
  0xa9   : > { %3039 = vmatmul.mubr.f32.gmra.mrb[4].mxu1 %v362_v17  ;;  %2985 = vmatprep.mubr.f32.mxu0 %v347_v18  ;;  %v397_v17 = vld [vmem:[%s4404_s2 + $0x1c0] sm:$0xff]  ;;  %v382_v18 = vld [vmem:[%s4404_s2 + $0x148] sm:$0xff] }
  0xaa   : > { %3041 = vmatprep.mubr.f32.mxu1 %v363_v19  ;;  %3467 = vmatpush3.bf16.msra.mxu0 %v3464_v10  ;;  %v378_v10 = vld [vmem:[%s4404_s2 + $0x128] sm:$0xff] }
  0xab   : > { %3499 = vmatpush3.bf16.msra.mxu1 %v3496_v11  ;;  %3469 = vmatprep.subr.bf16.mxu0 %v3468_v20  ;;  %v394_v11 = vld [vmem:[%s4404_s2 + $0x1a8] sm:$0xff] }
  0xac   : > { %2986 = vmatmul.mubr.f32.gmra.mrb[6].mxu0 %v348_v24  ;;  %3501 = vmatprep.subr.bf16.mxu1 %v3500_v21  ;;  %v398_v19 = vld [vmem:[%s4404_s2 + $0x1c8] sm:$0xff]  ;;  %v385_v24 = vld [vmem:[%s4404_s2 + $0x160] sm:$0xff] }
  0xad   : > { %3042 = vmatmul.mubr.f32.gmra.mrb[6].mxu1 %v364_v27  ;;  %2988 = vmatprep.mubr.f32.mxu0 %v349_v28  ;;  %v402_v27 = vld [vmem:[%s4404_s2 + $0x1e8] sm:$0xff]  ;;  %v387_v28 = vld [vmem:[%s4404_s2 + $0x170] sm:$0xff] }
  0xae   : > { %3044 = vmatprep.mubr.f32.mxu1 %v365_v29  ;;  %3471 = vmatpush3.bf16.msra.mxu0 %v3468_v20  ;;  %v383_v20 = vld [vmem:[%s4404_s2 + $0x150] sm:$0xff] }
  0xaf   : > { %3503 = vmatpush3.bf16.msra.mxu1 %v3500_v21  ;;  %3473 = vmatprep.subr.bf16.mxu0 %v3472_v30  ;;  %v399_v21 = vld [vmem:[%s4404_s2 + $0x1d0] sm:$0xff] }
  0xb0   : > { %2989 = vmatmul.mubr.f32.gmra.mrb[8].mxu0 %v350_v34  ;;  %3505 = vmatprep.subr.bf16.mxu1 %v3504_v31  ;;  %v403_v29 = vld [vmem:[%s4404_s2 + $0x1f0] sm:$0xff] }
  0xb1   : > { %3045 = vmatmul.mubr.f32.gmra.mrb[8].mxu1 %v366_v37  ;;  %2991 = vmatprep.mubr.f32.mxu0 %v351_v38 }
  0xb2   : > { %3047 = vmatprep.mubr.f32.mxu1 %v367_v39  ;;  %3475 = vmatpush3.bf16.msra.mxu0 %v3472_v30  ;;  %v388_v30 = vld [vmem:[%s4404_s2 + $0x178] sm:$0xff] }
  0xb3   : > { %3507 = vmatpush3.bf16.msra.mxu1 %v3504_v31  ;;  %3477 = vmatprep.subr.bf16.mxu0 %v3476_v40  ;;  %v404_v31 = vld [vmem:[%s4404_s2 + $0x1f8] sm:$0xff] }
  0xb4   : > { %2992 = vmatmul.mubr.f32.gmra.mrb[10].mxu0 %v352_v44  ;;  %3509 = vmatprep.subr.bf16.mxu1 %v3508_v41 }
  0xb5   : > { %3048 = vmatmul.mubr.f32.gmra.mrb[10].mxu1 %v368_v47  ;;  %2994 = vmatprep.mubr.f32.mxu0 %v353_v48 }
  0xb6   : > { %3050 = vmatprep.mubr.f32.mxu1 %v369_v49  ;;  %3479 = vmatpush3.bf16.msra.mxu0 %v3476_v40 }
  0xb7   : > { %3511 = vmatpush3.bf16.msra.mxu1 %v3508_v41  ;;  %3481 = vmatprep.subr.bf16.mxu0 %v3480_v50 }
  0xb8   : > { %2995 = vmatmul.mubr.f32.gmra.mrb[12].mxu0 %v354_v54  ;;  %3513 = vmatprep.subr.bf16.mxu1 %v3512_v51 }
  0xb9   : > { %3051 = vmatmul.mubr.f32.gmra.mrb[12].mxu1 %v370_v57  ;;  %2997 = vmatprep.mubr.f32.mxu0 %v355_v58 }
  0xba   : > { %3053 = vmatprep.mubr.f32.mxu1 %v371_v59  ;;  %3483 = vmatpush3.bf16.msra.mxu0 %v3480_v50 }
  0xbb   : > { %3515 = vmatpush3.bf16.msra.mxu1 %v3512_v51  ;;  %3485 = vmatprep.subr.bf16.mxu0 %v3484_v60 }
  0xbc   : > { %2998 = vmatmul.mubr.f32.gmra.mrb[14].mxu0 %v356_v62  ;;  %3517 = vmatprep.subr.bf16.mxu1 %v3516_v61 }
  0xbd   : > { %3054 = vmatmul.mubr.f32.gmra.mrb[14].mxu1 %v372_v63  ;;  %3088 = vmatprep.mubr.f32.mxu0 %v373_v0 }
  0xbe   : > { %3487 = vmatpush3.bf16.msra.mxu0 %v3484_v60  ;;  %3144 = vmatprep.mubr.f32.mxu1 %v389_v1 }
  0xbf   : > { %3519 = vmatpush3.bf16.msra.mxu1 %v3516_v61 }
  0xc1   : > { %3089 = vmatmul.mubr.f32.vlgmr.msra.gmra.mrb[16].mxu0 %v374_v2 }
  0xc2   : > { %3145 = vmatmul.mubr.f32.vlgmr.msra.gmra.mrb[16].mxu1 %v390_v3  ;;  %3091 = vmatprep.mubr.f32.mxu0 %v375_v4 }
  0xc3   : > { %3147 = vmatprep.mubr.f32.mxu1 %v391_v5 }
  0xc5   : > { %3092 = vmatmul.mubr.f32.gmra.mrb[18].mxu0 %v376_v6 }
  0xc6   : > { %3148 = vmatmul.mubr.f32.gmra.mrb[18].mxu1 %v392_v7  ;;  %3094 = vmatprep.mubr.f32.mxu0 %v377_v8 }
  0xc7   : > { %3150 = vmatprep.mubr.f32.mxu1 %v393_v9 }
  0xc9   : > { %3095 = vmatmul.mubr.f32.gmra.mrb[20].mxu0 %v378_v10 }
  0xca   : > { %3151 = vmatmul.mubr.f32.gmra.mrb[20].mxu1 %v394_v11  ;;  %3097 = vmatprep.mubr.f32.mxu0 %v379_v12 }
  0xcb   : > { %3153 = vmatprep.mubr.f32.mxu1 %v395_v13 }
  0xcd   : > { %3098 = vmatmul.mubr.f32.gmra.mrb[22].mxu0 %v380_v14 }
  0xce   : > { %3154 = vmatmul.mubr.f32.gmra.mrb[22].mxu1 %v396_v15  ;;  %3100 = vmatprep.mubr.f32.mxu0 %v381_v16 }
  0xcf   : > { %3156 = vmatprep.mubr.f32.mxu1 %v397_v17 }
  0xd1   : > { %3101 = vmatmul.mubr.f32.gmra.mrb[24].mxu0 %v382_v18 }
  0xd2   : > { %3157 = vmatmul.mubr.f32.gmra.mrb[24].mxu1 %v398_v19  ;;  %3103 = vmatprep.mubr.f32.mxu0 %v383_v20 }
  0xd3   : > { %3159 = vmatprep.mubr.f32.mxu1 %v399_v21 }
  0xd5   : > { %3104 = vmatmul.mubr.f32.gmra.mrb[26].mxu0 %v384_v22 }
  0xd6   : > { %3160 = vmatmul.mubr.f32.gmra.mrb[26].mxu1 %v400_v23  ;;  %3106 = vmatprep.mubr.f32.mxu0 %v385_v24 }
  0xd7   : > { %3162 = vmatprep.mubr.f32.mxu1 %v401_v25 }
  0xd9   : > { %3107 = vmatmul.mubr.f32.gmra.mrb[28].mxu0 %v386_v26 }
  0xda   : > { %3163 = vmatmul.mubr.f32.gmra.mrb[28].mxu1 %v402_v27  ;;  %3109 = vmatprep.mubr.f32.mxu0 %v387_v28 }
  0xdb   : > { %3165 = vmatprep.mubr.f32.mxu1 %v403_v29 }
  0xdd   : > { %3110 = vmatmul.mubr.f32.gmra.mrb[30].mxu0 %v388_v30 }
  0xde   : > { %3166 = vmatmul.mubr.f32.gmra.mrb[30].mxu1 %v404_v31 }
 0x173   : > { %v2978_v33 = vpop.f32.mrb[0].mxu0 }
 0x174   : > { %v4549_v34 = vmul.f32 %v2978_v33, %v4546_v32  ;;  %v599_v35 = vpop.f32.mrb[1].mxu0  ;;  %v3034_v36 = vpop.f32.mrb[0].mxu1 }
 0x175   : > { %v4552_v37 = vmul.f32 %v4546_v32, %v599_v35  ;;  %v744_v38 = vpop.f32.mrb[1].mxu1  ;;  %v4555_v39 = vmul.f32 %v3034_v36, %v4546_v32 }
 0x176   : > { %1180 = vmax.xlane.f32.xlu1 %v4549_v34  ;;  %v4559_v40 = vmul.f32 %v4546_v32, %v744_v38 }
 0x177   : > { %1178 = vmax.xlane.f32.xlu0 %v4552_v37  ;;  %v2981_v41 = vpop.f32.mrb[2].mxu0 }
 0x178   : > { %v3037_v42 = vpop.f32.mrb[2].mxu1  ;;  %v609_v43 = vpop.f32.mrb[3].mxu0  ;;  %v4567_v46 = vmul.f32 %v2981_v41, %v4546_v32 }
 0x179   : > { %v754_v44 = vpop.f32.mrb[3].mxu1  ;;  %v4564_v45 = vmul.f32 %v3037_v42, %v4546_v32  ;;  %v4576_v55 = vmul.f32 %v4546_v32, %v609_v43 }
 0x17a   : > { %1212 = vmax.xlane.f32.xlu1 %v4555_v39  ;;  %v4573_v52 = vmul.f32 %v4546_v32, %v754_v44 }
 0x17b   : > { %1210 = vmax.xlane.f32.xlu0 %v4559_v40  ;;  %v2984_v47 = vpop.f32.mrb[4].mxu0 }
 0x17c   : > { %v3040_v48 = vpop.f32.mrb[4].mxu1  ;;  %v619_v49 = vpop.f32.mrb[5].mxu0  ;;  %v4583_v58 = vmul.f32 %v2984_v47, %v4546_v32 }
 0x17d   : > { %v764_v50 = vpop.f32.mrb[5].mxu1  ;;  %v4580_v57 = vmul.f32 %v3040_v48, %v4546_v32  ;;  %v4592_v3 = vmul.f32 %v4546_v32, %v619_v49 }
 0x17e   : > { %1216 = vmax.xlane.f32.xlu1 %v4564_v45  ;;  %v4589_v0 = vmul.f32 %v4546_v32, %v764_v50 }
 0x17f   : > { %1184 = vmax.xlane.f32.xlu0 %v4567_v46  ;;  %v2987_v51 = vpop.f32.mrb[6].mxu0 }
 0x180   : > { %v3043_v53 = vpop.f32.mrb[6].mxu1  ;;  %v629_v54 = vpop.f32.mrb[7].mxu0  ;;  %v4599_v6 = vmul.f32 %v2987_v51, %v4546_v32 }
 0x181   : > { %v774_v56 = vpop.f32.mrb[7].mxu1  ;;  %v4596_v5 = vmul.f32 %v3043_v53, %v4546_v32  ;;  %v4618_v15 = vmul.f32 %v4546_v32, %v629_v54 }
 0x182   : > { %1214 = vmax.xlane.f32.xlu1 %v4573_v52  ;;  %v4611_v12 = vmul.f32 %v4546_v32, %v774_v56 }
 0x183   : > { %1182 = vmax.xlane.f32.xlu0 %v4576_v55  ;;  %v2990_v59 = vpop.f32.mrb[8].mxu0 }
 0x184   : > { %v3046_v60 = vpop.f32.mrb[8].mxu1  ;;  %v639_v61 = vpop.f32.mrb[9].mxu0  ;;  %v4627_v18 = vmul.f32 %v2990_v59, %v4546_v32 }
 0x185   : > { %v784_v62 = vpop.f32.mrb[9].mxu1  ;;  %v4624_v17 = vmul.f32 %v3046_v60, %v4546_v32  ;;  %v4648_v29 = vmul.f32 %v4546_v32, %v639_v61 }
 0x186   : > { %1220 = vmax.xlane.f32.xlu1 %v4580_v57  ;;  %v4645_v27 = vmul.f32 %v4546_v32, %v784_v62 }
 0x187   : > { %1188 = vmax.xlane.f32.xlu0 %v4583_v58  ;;  %v2993_v63 = vpop.f32.mrb[10].mxu0 }
 0x188   : > { %v3049_v1 = vpop.f32.mrb[10].mxu1  ;;  %v649_v2 = vpop.f32.mrb[11].mxu0  ;;  %v4664_v42 = vmul.f32 %v2993_v63, %v4546_v32 }
 0x189   : > { %v794_v4 = vpop.f32.mrb[11].mxu1  ;;  %v4655_v35 = vmul.f32 %v3049_v1, %v4546_v32  ;;  %v4688_v60 = vmul.f32 %v4546_v32, %v649_v2 }
 0x18a   : > { %1218 = vmax.xlane.f32.xlu1 %v4589_v0  ;;  %v4685_v56 = vmul.f32 %v4546_v32, %v794_v4 }
 0x18b   : > { %1186 = vmax.xlane.f32.xlu0 %v4592_v3  ;;  %v2996_v7 = vpop.f32.mrb[12].mxu0 }
 0x18c   : > { %v3052_v8 = vpop.f32.mrb[12].mxu1  ;;  %v4602_v9 = vpop.f32.mrb[13].mxu0  ;;  %v4704_v2 = vmul.f32 %v2996_v7, %v4546_v32 }
 0x18d   : > { %v4604_v10 = vpop.f32.mrb[13].mxu1  ;;  %v4695_v1 = vmul.f32 %v3052_v8, %v4546_v32 }
 0x18e   : > { %1224 = vmax.xlane.f32.xlu1 %v4596_v5  ;;  %5504 = vst [vmem:[#allocation17_spill] sm:$0xff] %v4704_v2 }
 0x18f   : > { %1192 = vmax.xlane.f32.xlu0 %v4599_v6  ;;  %v4608_v11 = vpop.f32.mrb[14].mxu0  ;;  %5503 = vst [vmem:[#allocation16_spill] sm:$0xff] %v4695_v1 }
 0x190   : > { %v4613_v13 = vpop.f32.mrb[14].mxu1  ;;  %v4615_v14 = vpop.f32.mrb[15].mxu0 }
 0x191   : > { %v4620_v16 = vpop.f32.mrb[15].mxu1 }
 0x192   : > { %1222 = vmax.xlane.f32.xlu1 %v4611_v12 }
 0x193   : > { %1190 = vmax.xlane.f32.xlu0 %v4618_v15 }
 0x194   : > { %v3090_v19 = vpop.f32.mrb[16].mxu0 }
 0x195   : > { %v4631_v20 = vmul.f32 %v3090_v19, %v4546_v32  ;;  %v3146_v21 = vpop.f32.mrb[16].mxu1  ;;  %v889_v22 = vpop.f32.mrb[17].mxu0 }
 0x196   : > { %1228 = vmax.xlane.f32.xlu1 %v4624_v17  ;;  %v4635_v23 = vmul.f32 %v3146_v21, %v4546_v32  ;;  %v4638_v24 = vmul.f32 %v4546_v32, %v889_v22  ;;  %v1034_v25 = vpop.f32.mrb[17].mxu1 }
 0x197   : > { %1196 = vmax.xlane.f32.xlu0 %v4627_v18  ;;  %v4642_v26 = vmul.f32 %v4546_v32, %v1034_v25 }
 0x198   : > { %v3093_v28 = vpop.f32.mrb[18].mxu0 }
 0x199   : > { %v4651_v30 = vmul.f32 %v3093_v28, %v4546_v32  ;;  %v3149_v31 = vpop.f32.mrb[18].mxu1  ;;  %v899_v33 = vpop.f32.mrb[19].mxu0 }
 0x19a   : > { %1226 = vmax.xlane.f32.xlu1 %v4645_v27  ;;  %v4658_v36 = vmul.f32 %v3149_v31, %v4546_v32  ;;  %v4661_v38 = vmul.f32 %v4546_v32, %v899_v33  ;;  %v1044_v41 = vpop.f32.mrb[19].mxu1 }
 0x19b   : > { %1194 = vmax.xlane.f32.xlu0 %v4648_v29  ;;  %v4668_v43 = vmul.f32 %v4546_v32, %v1044_v41 }
 0x19c   : > { %v3096_v44 = vpop.f32.mrb[20].mxu0 }
 0x19d   : > { %v4671_v47 = vmul.f32 %v3096_v44, %v4546_v32  ;;  %v3152_v48 = vpop.f32.mrb[20].mxu1  ;;  %v909_v49 = vpop.f32.mrb[21].mxu0 }
 0x19e   : > { %1232 = vmax.xlane.f32.xlu1 %v4655_v35  ;;  %v4675_v50 = vmul.f32 %v3152_v48, %v4546_v32  ;;  %v4678_v51 = vmul.f32 %v4546_v32, %v909_v49  ;;  %v1054_v53 = vpop.f32.mrb[21].mxu1  ;;  %v4726_v48 = vmul.f32 %v4546_v32, %v4604_v10 }
 0x19f   : > { %1200 = vmax.xlane.f32.xlu0 %v4664_v42  ;;  %v4682_v54 = vmul.f32 %v4546_v32, %v1054_v53  ;;  %v4730_v53 = vmul.f32 %v4546_v32, %v4602_v9  ;;  %v4748_v9 = vmul.f32 %v4608_v11, %v4546_v32 }
 0x1a0   : > { %v3099_v59 = vpop.f32.mrb[22].mxu0  ;;  %5505 = vst [vmem:[#allocation18_spill] sm:$0xff] %v4726_v48 }
 0x1a1   : > { %v4691_v61 = vmul.f32 %v3099_v59, %v4546_v32  ;;  %v3155_v62 = vpop.f32.mrb[22].mxu1  ;;  %v919_v63 = vpop.f32.mrb[23].mxu0  ;;  %5506 = vst [vmem:[#allocation19_spill] sm:$0xff] %v4730_v53  ;;  %5508 = vst [vmem:[#allocation21_spill] sm:$0xff] %v4748_v9 }
 0x1a2   : > { %1230 = vmax.xlane.f32.xlu1 %v4685_v56  ;;  %v4698_v19 = vmul.f32 %v3155_v62, %v4546_v32  ;;  %v4701_v4 = vmul.f32 %v4546_v32, %v919_v63  ;;  %v1064_v21 = vpop.f32.mrb[23].mxu1 }
 0x1a3   : > { %1198 = vmax.xlane.f32.xlu0 %v4688_v60  ;;  %v4708_v22 = vmul.f32 %v4546_v32, %v1064_v21  ;;  %v4738_v21 = vmul.f32 %v4613_v13, %v4546_v32 }
 0x1a4   : > { %v3102_v25 = vpop.f32.mrb[24].mxu0 }
 0x1a5   : > { %v4711_v28 = vmul.f32 %v3102_v25, %v4546_v32  ;;  %v3158_v8 = vpop.f32.mrb[24].mxu1  ;;  %v929_v31 = vpop.f32.mrb[25].mxu0  ;;  %5507 = vst [vmem:[#allocation20_spill] sm:$0xff] %v4738_v21 }
 0x1a6   : > { %1236 = vmax.xlane.f32.xlu1 %v4695_v1  ;;  %v4715_v33 = vmul.f32 %v3158_v8, %v4546_v32  ;;  %v4718_v41 = vmul.f32 %v4546_v32, %v929_v31  ;;  %v1074_v7 = vpop.f32.mrb[25].mxu1 }
 0x1a7   : > { %1204 = vmax.xlane.f32.xlu0 %v4704_v2  ;;  %v4722_v44 = vmul.f32 %v4546_v32, %v1074_v7 }
 0x1a8   : > { %v3105_v49 = vpop.f32.mrb[26].mxu0 }
 0x1a9   : > { %v4733_v59 = vmul.f32 %v3105_v49, %v4546_v32  ;;  %v3161_v62 = vpop.f32.mrb[26].mxu1  ;;  %v939_v63 = vpop.f32.mrb[27].mxu0 }
 0x1aa   : > { %1234 = vmax.xlane.f32.xlu1 %v4726_v48  ;;  %v4741_v25 = vmul.f32 %v3161_v62, %v4546_v32  ;;  %v4744_v10 = vmul.f32 %v4546_v32, %v939_v63  ;;  %v1084_v8 = vpop.f32.mrb[27].mxu1 }
 0x1ab   : > { %1202 = vmax.xlane.f32.xlu0 %v4730_v53  ;;  %v4752_v31 = vmul.f32 %v4546_v32, %v1084_v8 }
 0x1ac   : > { %v3108_v7 = vpop.f32.mrb[28].mxu0 }
 0x1ad   : > { %v4755_v13 = vmul.f32 %v3108_v7, %v4546_v32  ;;  %v3164_v49 = vpop.f32.mrb[28].mxu1  ;;  %v949_v62 = vpop.f32.mrb[29].mxu0  ;;  %v4770_v7 = vmul.f32 %v4546_v32, %v4620_v16 }
 0x1ae   : > { %1240 = vmax.xlane.f32.xlu1 %v4738_v21  ;;  %v4759_v63 = vmul.f32 %v3164_v49, %v4546_v32  ;;  %v4762_v48 = vmul.f32 %v4546_v32, %v949_v62  ;;  %v1094_v11 = vpop.f32.mrb[29].mxu1  ;;  %v4774_v21 = vmul.f32 %v4546_v32, %v4615_v14 }
 0x1af   : > { %5509 = vst [vmem:[#allocation22_spill] sm:$0xff] %v4755_v13  ;;  %1208 = vmax.xlane.f32.xlu0 %v4748_v9  ;;  %v4766_v8 = vmul.f32 %v4546_v32, %v1094_v11 }
 0x1b0   : > { %5510 = vst [vmem:[#allocation23_spill] sm:$0xff] %v4759_v63  ;;  %5511 = vst [vmem:[#allocation24_spill] sm:$0xff] %v4762_v48  ;;  %v3111_v53 = vpop.f32.mrb[30].mxu0 }
 0x1b1   : > { %5512 = vst [vmem:[#allocation25_spill] sm:$0xff] %v4766_v8  ;;  %v4777_v49 = vmul.f32 %v3111_v53, %v4546_v32  ;;  %v3167_v62 = vpop.f32.mrb[30].mxu1  ;;  %v959_v2 = vpop.f32.mrb[31].mxu0 }
 0x1b2   : > { %1238 = vmax.xlane.f32.xlu1 %v4770_v7  ;;  %v4781_v9 = vmul.f32 %v3167_v62, %v4546_v32  ;;  %v4784_v11 = vmul.f32 %v4546_v32, %v959_v2  ;;  %v1104_v16 = vpop.f32.mrb[31].mxu1 }
 0x1b3   : > { %5513 = vst [vmem:[#allocation26_spill] sm:$0xff] %v4777_v49  ;;  %1206 = vmax.xlane.f32.xlu0 %v4774_v21  ;;  %v4788_v1 = vmul.f32 %v4546_v32, %v1104_v16 }
 0x1b4   : > { %5514 = vst [vmem:[#allocation27_spill] sm:$0xff] %v4781_v9  ;;  %5515 = vst [vmem:[#allocation28_spill] sm:$0xff] %v4784_v11 }
 0x1b5   : > { %5516 = vst [vmem:[#allocation29_spill] sm:$0xff] %v4788_v1 }
 0x1b6   : > { %1276 = vmax.xlane.f32.xlu1 %v4635_v23 }
 0x1b7   : > { %1244 = vmax.xlane.f32.xlu0 %v4631_v20 }
 0x1ba   : > { %1274 = vmax.xlane.f32.xlu1 %v4642_v26 }
 0x1bb   : > { %1242 = vmax.xlane.f32.xlu0 %v4638_v24 }
 0x1be   : > { %1280 = vmax.xlane.f32.xlu1 %v4658_v36 }
 0x1bf   : > { %1248 = vmax.xlane.f32.xlu0 %v4651_v30 }
 0x1c2   : > { %1278 = vmax.xlane.f32.xlu1 %v4668_v43 }
 0x1c3   : > { %1246 = vmax.xlane.f32.xlu0 %v4661_v38 }
 0x1c6   : > { %1284 = vmax.xlane.f32.xlu1 %v4675_v50 }
 0x1c7   : > { %1252 = vmax.xlane.f32.xlu0 %v4671_v47 }
 0x1ca   : > { %1282 = vmax.xlane.f32.xlu1 %v4682_v54 }
 0x1cb   : > { %1250 = vmax.xlane.f32.xlu0 %v4678_v51 }
 0x1ce   : > { %1288 = vmax.xlane.f32.xlu1 %v4698_v19 }
 0x1cf   : > { %1256 = vmax.xlane.f32.xlu0 %v4691_v61 }
 0x1d2   : > { %1286 = vmax.xlane.f32.xlu1 %v4708_v22 }
 0x1d3   : > { %1254 = vmax.xlane.f32.xlu0 %v4701_v4 }
 0x1d6   : > { %1292 = vmax.xlane.f32.xlu1 %v4715_v33 }
 0x1d7   : > { %1260 = vmax.xlane.f32.xlu0 %v4711_v28 }
 0x1da   : > { %1290 = vmax.xlane.f32.xlu1 %v4722_v44 }
 0x1db   : > { %1258 = vmax.xlane.f32.xlu0 %v4718_v41 }
 0x1de   : > { %1296 = vmax.xlane.f32.xlu1 %v4741_v25 }
 0x1df   : > { %1264 = vmax.xlane.f32.xlu0 %v4733_v59 }
 0x1e2   : > { %1294 = vmax.xlane.f32.xlu1 %v4752_v31 }
 0x1e3   : > { %1262 = vmax.xlane.f32.xlu0 %v4744_v10 }
 0x1e6   : > { %1300 = vmax.xlane.f32.xlu1 %v4759_v63 }
 0x1e7   : > { %1268 = vmax.xlane.f32.xlu0 %v4755_v13 }
 0x1ea   : > { %1298 = vmax.xlane.f32.xlu1 %v4766_v8 }
 0x1eb   : > { %1266 = vmax.xlane.f32.xlu0 %v4762_v48 }
 0x1ee   : > { %1304 = vmax.xlane.f32.xlu1 %v4781_v9 }
 0x1ef   : > { %1272 = vmax.xlane.f32.xlu0 %v4777_v49 }
 0x1f2   : > { %1302 = vmax.xlane.f32.xlu1 %v4788_v1 }
 0x1f3   : > { %1270 = vmax.xlane.f32.xlu0 %v4784_v11 }
 0x203   : > { %v1181_v32 = vpop.xlane.xlu1 %1180 }
 0x204   : > { %v1307_v14 = vsub.f32 %v4549_v34, %v1181_v32  ;;  %v1179_v2 = vpop.xlane.xlu0 %1178 }
 0x205   : > { %v1306_v53 = vsub.f32 %v4552_v37, %v1179_v2 }
 0x206   : > { %v1372_v62 = vmul.f32 1.442695, %v1307_v14 }
 0x207   : > { %v1370_v16 = vmul.f32 1.442695, %v1306_v53  ;;  %v1213_v13 = vpop.xlane.xlu1 %1212 }
 0x208   : > { %3713 = vpow2.f32 %v1372_v62  ;;  %v1323_v48 = vsub.f32 %v4555_v39, %v1213_v13  ;;  %v1211_v8 = vpop.xlane.xlu0 %1210  ;;  %v472_v62 = vld [vmem:[%s4830_s27 + $0x18] sm:$0xff] }
 0x209   : > { %v1322_v49 = vsub.f32 %v4559_v40, %v1211_v8  ;;  %3715 = vpow2.f32 %v1370_v16  ;;  %v469_v40 = vld [vmem:[%s4830_s27] sm:$0xff] }
 0x20a   : > { %v1404_v9 = vmul.f32 1.442695, %v1323_v48  ;;  %v470_v48 = vld [vmem:[%s4830_s27 + $0x8] sm:$0xff]  ;;  %v485_v16 = vld [vmem:[%s4830_s27 + $0x80] sm:$0xff] }
 0x20b   : > { %v1217_v1 = vpop.xlane.xlu1 %1216  ;;  %v1402_v11 = vmul.f32 1.442695, %v1322_v49 }
 0x20c   : > { %3717 = vpow2.f32 %v1404_v9  ;;  %v1325_v34 = vsub.f32 %v4564_v45, %v1217_v1  ;;  %v1185_v32 = vpop.xlane.xlu0 %1184 }
 0x20d   : > { %v1309_v37 = vsub.f32 %v4567_v46, %v1185_v32  ;;  %3719 = vpow2.f32 %v1402_v11  ;;  %v3520_v46 = vpack.c.bf16 %v470_v48, %v469_v40  ;;  %v487_v40 = vld [vmem:[%s4830_s27 + $0x90] sm:$0xff]  ;;  %v488_v48 = vld [vmem:[%s4830_s27 + $0x98] sm:$0xff] }
 0x20e   : > { %v1408_v53 = vmul.f32 1.442695, %v1325_v34 }
 0x20f   : > { %v1376_v14 = vmul.f32 1.442695, %v1309_v37  ;;  %v1215_v2 = vpop.xlane.xlu1 %1214  ;;  %3521 = vmatprep.subr.bf16.mxu0 %v3520_v46 }
 0x210   : > { %v1324_v39 = vsub.f32 %v4573_v52, %v1215_v2  ;;  %v1183_v13 = vpop.xlane.xlu0 %1182  ;;  %3523 = vmatpush3.bf16.msra.mxu0 %v3520_v46  ;;  %v473_v2 = vld [vmem:[%s4830_s27 + $0x20] sm:$0xff] }
 0x211   : > { %3721 = vpow2.f32 %v1376_v14  ;;  %v1308_v45 = vsub.f32 %v4576_v55, %v1183_v13  ;;  %v471_v55 = vld [vmem:[%s4830_s27 + $0x10] sm:$0xff]  ;;  %v486_v14 = vld [vmem:[%s4830_s27 + $0x88] sm:$0xff] }
 0x212   : > { %v4835_v1 = vpop.eup %3713  ;;  %3723 = vpow2.f32 %v1408_v53  ;;  %v1406_v52 = vmul.f32 1.442695, %v1324_v39  ;;  %v3524_v37 = vpack.c.bf16 %v472_v62, %v471_v55  ;;  %v3552_v39 = vpack.c.bf16 %v486_v14, %v485_v16  ;;  %v490_v55 = vld [vmem:[%s4830_s27 + $0xa8] sm:$0xff] }
 0x213   : > { %5517 = vst [vmem:[#allocation30_spill] sm:$0xff] %v4835_v1  ;;  %v1374_v9 = vmul.f32 1.442695, %v1308_v45  ;;  %v1221_v8 = vpop.xlane.xlu1 %1220  ;;  %1500 = vadd.xlane.f32.xlu0 %v4835_v1  ;;  %v4842_v34 = vpop.eup %3715  ;;  %v475_v45 = vld [vmem:[%s4830_s27 + $0x30] sm:$0xff] }
 0x214   : > { %v1327_v49 = vsub.f32 %v4580_v57, %v1221_v8  ;;  %v1189_v11 = vpop.xlane.xlu0 %1188  ;;  %v474_v57 = vld [vmem:[%s4830_s27 + $0x28] sm:$0xff]  ;;  %v476_v8 = vld [vmem:[%s4830_s27 + $0x38] sm:$0xff]  ;;  %3525 = vmatprep.subr.bf16.mxu0 %v3524_v37  ;;  %3553 = vmatprep.subr.bf16.mxu1 %v3552_v39 }
 0x215   : > { %3725 = vpow2.f32 %v1374_v9  ;;  %v1311_v32 = vsub.f32 %v4583_v58, %v1189_v11  ;;  %v3528_v13 = vpack.c.bf16 %v474_v57, %v473_v2  ;;  %v3556_v58 = vpack.c.bf16 %v488_v48, %v487_v40  ;;  %v489_v11 = vld [vmem:[%s4830_s27 + $0xa0] sm:$0xff]  ;;  %3527 = vmatpush3.bf16.msra.mxu0 %v3524_v37  ;;  %3555 = vmatpush3.bf16.msra.mxu1 %v3552_v39 }
 0x216   : > { %v4848_v53 = vpop.eup %3717  ;;  %3727 = vpow2.f32 %v1406_v52  ;;  %v1412_v62 = vmul.f32 1.442695, %v1327_v49  ;;  %v3532_v14 = vpack.c.bf16 %v476_v8, %v475_v45  ;;  %v3560_v2 = vpack.c.bf16 %v490_v55, %v489_v11  ;;  %v492_v11 = vld [vmem:[%s4830_s27 + $0xb8] sm:$0xff] }
 0x217   : > { %v1380_v46 = vmul.f32 1.442695, %v1311_v32  ;;  %1532 = vadd.xlane.f32.xlu1 %v4848_v53  ;;  %v1219_v9 = vpop.xlane.xlu1 %1218  ;;  %1498 = vadd.xlane.f32.xlu0 %v4842_v34  ;;  %v4860_v32 = vpop.eup %3719 }
 0x218   : > { %v1326_v1 = vsub.f32 %v4589_v0, %v1219_v9  ;;  %v1187_v63 = vpop.xlane.xlu0 %1186  ;;  %3529 = vmatprep.subr.bf16.mxu0 %v3528_v13  ;;  %3557 = vmatprep.subr.bf16.mxu1 %v3556_v58  ;;  %v491_v9 = vld [vmem:[%s4830_s27 + $0xb0] sm:$0xff] }
 0x219   : > { %3729 = vpow2.f32 %v1380_v46  ;;  %v1310_v16 = vsub.f32 %v4592_v3, %v1187_v63  ;;  %3531 = vmatpush3.bf16.msra.mxu0 %v3528_v13  ;;  %3559 = vmatpush3.bf16.msra.mxu1 %v3556_v58  ;;  %v477_v13 = vld [vmem:[%s4830_s27 + $0x40] sm:$0xff]  ;;  %v478_v46 = vld [vmem:[%s4830_s27 + $0x48] sm:$0xff] }
 0x21a   : > { %3731 = vpow2.f32 %v1412_v62  ;;  %v1410_v0 = vmul.f32 1.442695, %v1326_v1  ;;  %3533 = vmatprep.subr.bf16.mxu0 %v3532_v14  ;;  %3561 = vmatprep.subr.bf16.mxu1 %v3560_v2  ;;  %v3536_v8 = vpack.c.bf16 %v478_v46, %v477_v13  ;;  %v3564_v62 = vpack.c.bf16 %v492_v11, %v491_v9  ;;  %v495_v11 = vld [vmem:[%s4830_s27 + $0xd0] sm:$0xff] }
 0x21b   : > { %v4862_v57 = vpop.eup %3721  ;;  %v1378_v52 = vmul.f32 1.442695, %v1310_v16  ;;  %v1225_v49 = vpop.xlane.xlu1 %1224  ;;  %1530 = vadd.xlane.f32.xlu1 %v4860_v32 }
 0x21c   : > { %v1329_v40 = vsub.f32 %v4596_v5, %v1225_v49  ;;  %1504 = vadd.xlane.f32.xlu0 %v4862_v57  ;;  %v1193_v3 = vpop.xlane.xlu0 %1192  ;;  %v4868_v37 = vpop.eup %3723 }
 0x21d   : > { %3733 = vpow2.f32 %v1378_v52  ;;  %v1313_v63 = vsub.f32 %v4599_v6, %v1193_v3  ;;  %3535 = vmatpush3.bf16.msra.mxu0 %v3532_v14  ;;  %3563 = vmatpush3.bf16.msra.mxu1 %v3560_v2  ;;  %v493_v3 = vld [vmem:[%s4830_s27 + $0xc0] sm:$0xff] }
 0x21e   : > { %3735 = vpow2.f32 %v1410_v0  ;;  %v1416_v48 = vmul.f32 1.442695, %v1329_v40  ;;  %3537 = vmatprep.subr.bf16.mxu0 %v3536_v8  ;;  %3565 = vmatprep.subr.bf16.mxu1 %v3564_v62  ;;  %v479_v0 = vld [vmem:[%s4830_s27 + $0x50] sm:$0xff]  ;;  %v480_v40 = vld [vmem:[%s4830_s27 + $0x58] sm:$0xff] }
 0x21f   : > { %v4870_v39 = vpop.eup %3725  ;;  %v1384_v1 = vmul.f32 1.442695, %v1313_v63  ;;  %v1223_v5 = vpop.xlane.xlu1 %1222  ;;  %1536 = vadd.xlane.f32.xlu1 %v4868_v37 }
 0x220   : > { %v1328_v45 = vsub.f32 %v4611_v12, %v1223_v5  ;;  %1502 = vadd.xlane.f32.xlu0 %v4870_v39  ;;  %v1191_v6 = vpop.xlane.xlu0 %1190  ;;  %v4880_v55 = vpop.eup %3727  ;;  %v494_v5 = vld [vmem:[%s4830_s27 + $0xc8] sm:$0xff] }
 0x221   : > { %3737 = vpow2.f32 %v1384_v1  ;;  %v1312_v58 = vsub.f32 %v4618_v15, %v1191_v6  ;;  %3539 = vmatpush3.bf16.msra.mxu0 %v3536_v8  ;;  %3567 = vmatpush3.bf16.msra.mxu1 %v3564_v62  ;;  %v3540_v1 = vpack.c.bf16 %v480_v40, %v479_v0  ;;  %v3568_v6 = vpack.c.bf16 %v494_v5, %v493_v3  ;;  %v482_v8 = vld [vmem:[%s4830_s27 + $0x68] sm:$0xff]  ;;  %v483_v3 = vld [vmem:[%s4830_s27 + $0x70] sm:$0xff]  ;;  %v497_v5 = vld [vmem:[%s4830_s27 + $0xe0] sm:$0xff] }
 0x222   : > { %3739 = vpow2.f32 %v1416_v48  ;;  %v1414_v15 = vmul.f32 1.442695, %v1328_v45 }
 0x223   : > { %v4882_v16 = vpop.eup %3729  ;;  %v1382_v12 = vmul.f32 1.442695, %v1312_v58  ;;  %v1229_v52 = vpop.xlane.xlu1 %1228  ;;  %1534 = vadd.xlane.f32.xlu1 %v4880_v55  ;;  %3541 = vmatprep.subr.bf16.mxu0 %v3540_v1  ;;  %v481_v58 = vld [vmem:[%s4830_s27 + $0x60] sm:$0xff] }
 0x224   : > { %v1331_v14 = vsub.f32 %v4624_v17, %v1229_v52  ;;  %1508 = vadd.xlane.f32.xlu0 %v4882_v16  ;;  %v1197_v2 = vpop.xlane.xlu0 %1196  ;;  %v4891_v63 = vpop.eup %3731  ;;  %3569 = vmatprep.subr.bf16.mxu1 %v3568_v6  ;;  %v496_v52 = vld [vmem:[%s4830_s27 + $0xd8] sm:$0xff] }
 0x225   : > { %3741 = vpow2.f32 %v1382_v12  ;;  %v1315_v49 = vsub.f32 %v4627_v18, %v1197_v2  ;;  %3543 = vmatpush3.bf16.msra.mxu0 %v3540_v1  ;;  %3571 = vmatpush3.bf16.msra.mxu1 %v3568_v6  ;;  %v3544_v12 = vpack.c.bf16 %v482_v8, %v481_v58  ;;  %v484_v1 = vld [vmem:[%s4830_s27 + $0x78] sm:$0xff]  ;;  %v498_v6 = vld [vmem:[%s4830_s27 + $0xe8] sm:$0xff] }
 0x226   : > { %3743 = vpow2.f32 %v1414_v15  ;;  %v1420_v18 = vmul.f32 1.442695, %v1331_v14 }
 0x227   : > { %v4894_v48 = vpop.eup %3733  ;;  %v1388_v17 = vmul.f32 1.442695, %v1315_v49  ;;  %v1227_v45 = vpop.xlane.xlu1 %1226  ;;  %1540 = vadd.xlane.f32.xlu1 %v4891_v63  ;;  %3545 = vmatprep.subr.bf16.mxu0 %v3544_v12 }
 0x228   : > { %v1330_v13 = vsub.f32 %v4645_v27, %v1227_v45  ;;  %1506 = vadd.xlane.f32.xlu0 %v4894_v48  ;;  %v1195_v46 = vpop.xlane.xlu0 %1194  ;;  %v4903_v62 = vpop.eup %3735  ;;  %v3548_v45 = vpack.c.bf16 %v484_v1, %v483_v3 }
 0x229   : > { %3745 = vpow2.f32 %v1388_v17  ;;  %v1314_v9 = vsub.f32 %v4648_v29, %v1195_v46  ;;  %v3572_v29 = vpack.c.bf16 %v496_v52, %v495_v11  ;;  %3547 = vmatpush3.bf16.msra.mxu0 %v3544_v12  ;;  %v3576_v46 = vpack.c.bf16 %v498_v6, %v497_v5  ;;  %v499_v11 = vld [vmem:[%s4830_s27 + $0xf0] sm:$0xff]  ;;  %v500_v12 = vld [vmem:[%s4830_s27 + $0xf8] sm:$0xff] }
 0x22a   : > { %3747 = vpow2.f32 %v1420_v18  ;;  %v1418_v2 = vmul.f32 1.442695, %v1330_v13  ;;  %3549 = vmatprep.subr.bf16.mxu0 %v3548_v45 }
 0x22b   : > { %v4906_v15 = vpop.eup %3737  ;;  %v1386_v27 = vmul.f32 1.442695, %v1314_v9  ;;  %v1233_v14 = vpop.xlane.xlu1 %1232  ;;  %1538 = vadd.xlane.f32.xlu1 %v4903_v62  ;;  %3573 = vmatprep.subr.bf16.mxu1 %v3572_v29 }
 0x22c   : > { %v1333_v49 = vsub.f32 %v4655_v35, %v1233_v14  ;;  %1512 = vadd.xlane.f32.xlu0 %v4906_v15  ;;  %v1201_v0 = vpop.xlane.xlu0 %1200  ;;  %v4915_v17 = vpop.eup %3739  ;;  %3575 = vmatpush3.bf16.msra.mxu1 %v3572_v29 }
 0x22d   : > { %3749 = vpow2.f32 %v1386_v27  ;;  %v1317_v40 = vsub.f32 %v4664_v42, %v1201_v0  ;;  %3577 = vmatprep.subr.bf16.mxu1 %v3576_v46  ;;  %3551 = vmatpush3.bf16.msra.mxu0 %v3548_v45  ;;  %v3580_v27 = vpack.c.bf16 %v500_v12, %v499_v11 }
 0x22e   : > { %3751 = vpow2.f32 %v1418_v2  ;;  %v1424_v42 = vmul.f32 1.442695, %v1333_v49  ;;  %v5518_v49 = vld [vmem:[#allocation16_spill] sm:$0xff] }
 0x22f   : > { %v4918_v18 = vpop.eup %3741  ;;  %v1392_v35 = vmul.f32 1.442695, %v1317_v40  ;;  %v1231_v13 = vpop.xlane.xlu1 %1230  ;;  %1544 = vadd.xlane.f32.xlu1 %v4915_v17  ;;  %v5519_v40 = vld [vmem:[#allocation17_spill] sm:$0xff] }
 0x230   : > { %v1332_v9 = vsub.f32 %v4685_v56, %v1231_v13  ;;  %1510 = vadd.xlane.f32.xlu0 %v4918_v18  ;;  %v1199_v58 = vpop.xlane.xlu0 %1198  ;;  %v4926_v52 = vpop.eup %3743  ;;  %3579 = vmatpush3.bf16.msra.mxu1 %v3576_v46  ;;  %v5520_v13 = vld [vmem:[#allocation18_spill] sm:$0xff] }
 0x231   : > { %3753 = vpow2.f32 %v1392_v35  ;;  %v1316_v8 = vsub.f32 %v4688_v60, %v1199_v58  ;;  %3581 = vmatprep.subr.bf16.mxu1 %v3580_v27 }
 0x232   : > { %3755 = vpow2.f32 %v1424_v42  ;;  %v1422_v56 = vmul.f32 1.442695, %v1332_v9  ;;  %v5521_v9 = vld [vmem:[#allocation19_spill] sm:$0xff] }
 0x233   : > { %v4928_v14 = vpop.eup %3745  ;;  %v1390_v29 = vmul.f32 1.442695, %v1316_v8  ;;  %v1237_v2 = vpop.xlane.xlu1 %1236  ;;  %1542 = vadd.xlane.f32.xlu1 %v4926_v52 }
 0x234   : > { %v1335_v0 = vsub.f32 %v5518_v49, %v1237_v2  ;;  %1516 = vadd.xlane.f32.xlu0 %v4928_v14  ;;  %v1205_v60 = vpop.xlane.xlu0 %1204  ;;  %v4934_v1 = vpop.eup %3747  ;;  %3583 = vmatpush3.bf16.msra.mxu1 %v3580_v27  ;;  %v5522_v2 = vld [vmem:[#allocation20_spill] sm:$0xff] }
 0x235   : > { %3757 = vpow2.f32 %v1390_v29  ;;  %v1319_v3 = vsub.f32 %v5519_v40, %v1205_v60 }
 0x236   : > { %3759 = vpow2.f32 %v1422_v56  ;;  %v1428_v35 = vmul.f32 1.442695, %v1335_v0  ;;  %v5523_v0 = vld [vmem:[#allocation21_spill] sm:$0xff] }
 0x237   : > { %v4936_v5 = vpop.eup %3749  ;;  %v1396_v45 = vmul.f32 1.442695, %v1319_v3  ;;  %v1235_v6 = vpop.xlane.xlu1 %1234  ;;  %1548 = vadd.xlane.f32.xlu1 %v4934_v1 }
 0x238   : > { %v1334_v46 = vsub.f32 %v5520_v13, %v1235_v6  ;;  %1514 = vadd.xlane.f32.xlu0 %v4936_v5  ;;  %v1203_v42 = vpop.xlane.xlu0 %1202  ;;  %v4942_v8 = vpop.eup %3751 }
 0x239   : > { %3761 = vpow2.f32 %v1396_v45  ;;  %v1318_v58 = vsub.f32 %v5521_v9, %v1203_v42 }
 0x23a   : > { %3763 = vpow2.f32 %v1428_v35  ;;  %v1426_v29 = vmul.f32 1.442695, %v1334_v46 }
 0x23b   : > { %v4944_v11 = vpop.eup %3753  ;;  %v1394_v12 = vmul.f32 1.442695, %v1318_v58  ;;  %v1241_v27 = vpop.xlane.xlu1 %1240  ;;  %1546 = vadd.xlane.f32.xlu1 %v4942_v8 }
 0x23c   : > { %v1337_v56 = vsub.f32 %v5522_v2, %v1241_v27  ;;  %1520 = vadd.xlane.f32.xlu0 %v4944_v11  ;;  %v1209_v49 = vpop.xlane.xlu0 %1208  ;;  %v4950_v40 = vpop.eup %3755 }
 0x23d   : > { %3765 = vpow2.f32 %v1394_v12  ;;  %v1321_v60 = vsub.f32 %v5523_v0, %v1209_v49 }
 0x23e   : > { %3767 = vpow2.f32 %v1426_v29  ;;  %v1432_v13 = vmul.f32 1.442695, %v1337_v56 }
 0x23f   : > { %v4952_v3 = vpop.eup %3757  ;;  %v1400_v45 = vmul.f32 1.442695, %v1321_v60  ;;  %v1239_v6 = vpop.xlane.xlu1 %1238  ;;  %1552 = vadd.xlane.f32.xlu1 %v4950_v40 }
 0x240   : > { %v1336_v35 = vsub.f32 %v4770_v7, %v1239_v6  ;;  %1518 = vadd.xlane.f32.xlu0 %v4952_v3  ;;  %v1207_v46 = vpop.xlane.xlu0 %1206  ;;  %v4958_v9 = vpop.eup %3759 }
 0x241   : > { %3769 = vpow2.f32 %v1400_v45  ;;  %v1320_v42 = vsub.f32 %v4774_v21, %v1207_v46 }
 0x242   : > { %3771 = vpow2.f32 %v1432_v13  ;;  %v1430_v2 = vmul.f32 1.442695, %v1336_v35 }
 0x243   : > { %v4960_v58 = vpop.eup %3761  ;;  %v1398_v12 = vmul.f32 1.442695, %v1320_v42  ;;  %v1277_v27 = vpop.xlane.xlu1 %1276  ;;  %1550 = vadd.xlane.f32.xlu1 %v4958_v9 }
 0x244   : > { %v1355_v29 = vsub.f32 %v4635_v23, %v1277_v27  ;;  %1524 = vadd.xlane.f32.xlu0 %v4960_v58  ;;  %v1245_v7 = vpop.xlane.xlu0 %1244  ;;  %v4966_v49 = vpop.eup %3763 }
 0x245   : > { %3773 = vpow2.f32 %v1398_v12  ;;  %v1339_v56 = vsub.f32 %v4631_v20, %v1245_v7 }
 0x246   : > { %3775 = vpow2.f32 %v1430_v2  ;;  %v1468_v45 = vmul.f32 1.442695, %v1355_v29 }
 0x247   : > { %v4968_v21 = vpop.eup %3765  ;;  %v1436_v0 = vmul.f32 1.442695, %v1339_v56  ;;  %v1275_v60 = vpop.xlane.xlu1 %1274  ;;  %1556 = vadd.xlane.f32.xlu1 %v4966_v49 }
 0x248   : > { %v1354_v6 = vsub.f32 %v4642_v26, %v1275_v60  ;;  %1522 = vadd.xlane.f32.xlu0 %v4968_v21  ;;  %v1243_v23 = vpop.xlane.xlu0 %1242  ;;  %v4974_v35 = vpop.eup %3767 }
 0x249   : > { %3777 = vpow2.f32 %v1436_v0  ;;  %v1338_v13 = vsub.f32 %v4638_v24, %v1243_v23  ;;  %v502_v23 = vld [vmem:[%s4830_s27 + $0x108] sm:$0xff] }
 0x24a   : > { %3779 = vpow2.f32 %v1468_v45  ;;  %v1466_v12 = vmul.f32 1.442695, %v1354_v6 }
 0x24b   : > { %v4976_v20 = vpop.eup %3769  ;;  %v1434_v46 = vmul.f32 1.442695, %v1338_v13  ;;  %v1281_v42 = vpop.xlane.xlu1 %1280  ;;  %1554 = vadd.xlane.f32.xlu1 %v4974_v35 }
 0x24c   : > { %v1357_v27 = vsub.f32 %v4658_v36, %v1281_v42  ;;  %1528 = vadd.xlane.f32.xlu0 %v4976_v20  ;;  %v1249_v26 = vpop.xlane.xlu0 %1248  ;;  %v4982_v2 = vpop.eup %3771 }
 0x24d   : > { %3781 = vpow2.f32 %v1434_v46  ;;  %v1341_v24 = vsub.f32 %v4651_v30, %v1249_v26  ;;  %v501_v30 = vld [vmem:[%s4830_s27 + $0x100] sm:$0xff] }
 0x24e   : > { %3783 = vpow2.f32 %v1466_v12  ;;  %v1472_v0 = vmul.f32 1.442695, %v1357_v27  ;;  %v4997_v12 = vpack.c.bf16 %v502_v23, %v501_v30 }
 0x24f   : > { %v4984_v29 = vpop.eup %3773  ;;  %v1440_v7 = vmul.f32 1.442695, %v1341_v24  ;;  %v1279_v56 = vpop.xlane.xlu1 %1278  ;;  %1560 = vadd.xlane.f32.xlu1 %v4982_v2  ;;  %v517_v24 = vld [vmem:[%s4830_s27 + $0x180] sm:$0xff] }
 0x250   : > { %v1356_v36 = vsub.f32 %v4668_v43, %v1279_v56  ;;  %1526 = vadd.xlane.f32.xlu0 %v4984_v29  ;;  %v1247_v60 = vpop.xlane.xlu0 %1246  ;;  %v4990_v6 = vpop.eup %3775  ;;  %3585 = vmatprep.subr.bf16.mxu0 %v4997_v12 }
 0x251   : > { %3785 = vpow2.f32 %v1440_v7  ;;  %v1340_v45 = vsub.f32 %v4661_v38, %v1247_v60  ;;  %v518_v7 = vld [vmem:[%s4830_s27 + $0x188] sm:$0xff] }
 0x252   : > { %3787 = vpow2.f32 %v1472_v0  ;;  %v1470_v43 = vmul.f32 1.442695, %v1356_v36  ;;  %v5007_v60 = vpack.c.bf16 %v518_v7, %v517_v24 }
 0x253   : > { %v4994_v13 = vpop.eup %3777  ;;  %v1438_v46 = vmul.f32 1.442695, %v1340_v45  ;;  %v1285_v42 = vpop.xlane.xlu1 %1284  ;;  %1558 = vadd.xlane.f32.xlu1 %v4990_v6 }
 0x254   : > { %v1359_v27 = vsub.f32 %v4675_v50, %v1285_v42  ;;  %1564 = vadd.xlane.f32.xlu0 %v4994_v13  ;;  %v1253_v38 = vpop.xlane.xlu0 %1252  ;;  %v5005_v56 = vpop.eup %3779  ;;  %3617 = vmatprep.subr.bf16.mxu1 %v5007_v60 }
 0x255   : > { %3789 = vpow2.f32 %v1438_v46  ;;  %v1343_v26 = vsub.f32 %v4671_v47, %v1253_v38 }
 0x256   : > { %3791 = vpow2.f32 %v1470_v43  ;;  %v1476_v50 = vmul.f32 1.442695, %v1359_v27 }
 0x257   : > { %v5009_v45 = vpop.eup %3781  ;;  %v1444_v0 = vmul.f32 1.442695, %v1343_v26  ;;  %v1283_v36 = vpop.xlane.xlu1 %1282  ;;  %1596 = vadd.xlane.f32.xlu1 %v5005_v56 }
 0x258   : > { %v1358_v30 = vsub.f32 %v4682_v54, %v1283_v36  ;;  %1562 = vadd.xlane.f32.xlu0 %v5009_v45  ;;  %v1251_v47 = vpop.xlane.xlu0 %1250  ;;  %v5016_v46 = vpop.eup %3783 }
 0x259   : > { %3793 = vpow2.f32 %v1444_v0  ;;  %v1342_v23 = vsub.f32 %v4678_v51, %v1251_v47 }
 0x25a   : > { %3795 = vpow2.f32 %v1476_v50  ;;  %v1474_v43 = vmul.f32 1.442695, %v1358_v30 }
 0x25b   : > { %v5018_v42 = vpop.eup %3785  ;;  %v1442_v38 = vmul.f32 1.442695, %v1342_v23  ;;  %v1289_v26 = vpop.xlane.xlu1 %1288  ;;  %1594 = vadd.xlane.f32.xlu1 %v5016_v46 }
 0x25c   : > { %v1361_v54 = vsub.f32 %v4698_v19, %v1289_v26  ;;  %1568 = vadd.xlane.f32.xlu0 %v5018_v42  ;;  %v1257_v27 = vpop.xlane.xlu0 %1256  ;;  %v5024_v7 = vpop.eup %3787 }
 0x25d   : > { %3797 = vpow2.f32 %v1442_v38  ;;  %v1345_v24 = vsub.f32 %v4691_v61, %v1257_v27 }
 0x25e   : > { %3799 = vpow2.f32 %v1474_v43  ;;  %v1480_v47 = vmul.f32 1.442695, %v1361_v54 }
 0x25f   : > { %v5026_v51 = vpop.eup %3789  ;;  %v1448_v0 = vmul.f32 1.442695, %v1345_v24  ;;  %v1287_v36 = vpop.xlane.xlu1 %1286  ;;  %1600 = vadd.xlane.f32.xlu1 %v5024_v7 }
 0x260   : > { %v1360_v50 = vsub.f32 %v4708_v22, %v1287_v36  ;;  %1566 = vadd.xlane.f32.xlu0 %v5026_v51  ;;  %v1255_v19 = vpop.xlane.xlu0 %1254  ;;  %v5032_v23 = vpop.eup %3791 }
 0x261   : > { %3801 = vpow2.f32 %v1448_v0  ;;  %v1344_v30 = vsub.f32 %v4701_v4, %v1255_v19 }
 0x262   : > { %3803 = vpow2.f32 %v1480_v47  ;;  %v1478_v27 = vmul.f32 1.442695, %v1360_v50 }
 0x263   : > { %v5034_v61 = vpop.eup %3793  ;;  %v1446_v38 = vmul.f32 1.442695, %v1344_v30  ;;  %v1293_v26 = vpop.xlane.xlu1 %1292  ;;  %1598 = vadd.xlane.f32.xlu1 %v5032_v23 }
 0x264   : > { %v1363_v43 = vsub.f32 %v4715_v33, %v1293_v26  ;;  %1572 = vadd.xlane.f32.xlu0 %v5034_v61  ;;  %v1261_v22 = vpop.xlane.xlu0 %1260  ;;  %v5040_v24 = vpop.eup %3795 }
 0x265   : > { %3805 = vpow2.f32 %v1446_v38  ;;  %v1347_v54 = vsub.f32 %v4711_v28, %v1261_v22 }
 0x266   : > { %3807 = vpow2.f32 %v1478_v27  ;;  %v1484_v19 = vmul.f32 1.442695, %v1363_v43 }
 0x267   : > { %v5042_v4 = vpop.eup %3797  ;;  %v1452_v0 = vmul.f32 1.442695, %v1347_v54  ;;  %v1291_v36 = vpop.xlane.xlu1 %1290  ;;  %1604 = vadd.xlane.f32.xlu1 %v5040_v24 }
 0x268   : > { %v1362_v47 = vsub.f32 %v4722_v44, %v1291_v36  ;;  %1570 = vadd.xlane.f32.xlu0 %v5042_v4  ;;  %v1259_v33 = vpop.xlane.xlu0 %1258  ;;  %v5048_v30 = vpop.eup %3799 }
 0x269   : > { %3809 = vpow2.f32 %v1452_v0  ;;  %v1346_v50 = vsub.f32 %v4718_v41, %v1259_v33 }
 0x26a   : > { %3811 = vpow2.f32 %v1484_v19  ;;  %v1482_v22 = vmul.f32 1.442695, %v1362_v47 }
 0x26b   : > { %v5050_v28 = vpop.eup %3801  ;;  %v1450_v38 = vmul.f32 1.442695, %v1346_v50  ;;  %v1297_v26 = vpop.xlane.xlu1 %1296  ;;  %1602 = vadd.xlane.f32.xlu1 %v5048_v30 }
 0x26c   : > { %5524 = vst [vmem:[#allocation16_spill] sm:$0xff] %v5050_v28  ;;  %v1365_v27 = vsub.f32 %v4741_v25, %v1297_v26  ;;  %1576 = vadd.xlane.f32.xlu0 %v5050_v28  ;;  %v1265_v44 = vpop.xlane.xlu0 %1264  ;;  %v5056_v54 = vpop.eup %3803 }
 0x26d   : > { %3813 = vpow2.f32 %v1450_v38  ;;  %v1349_v43 = vsub.f32 %v4733_v59, %v1265_v44  ;;  %5525 = vst [vmem:[#allocation17_spill] sm:$0xff] %v5056_v54 }
 0x26e   : > { %3815 = vpow2.f32 %v1482_v22  ;;  %v1488_v33 = vmul.f32 1.442695, %v1365_v27  ;;  %v5529_v22 = vld [vmem:[#allocation23_spill] sm:$0xff] }
 0x26f   : > { %v5058_v41 = vpop.eup %3805  ;;  %v1456_v0 = vmul.f32 1.442695, %v1349_v43  ;;  %v1295_v36 = vpop.xlane.xlu1 %1294  ;;  %1608 = vadd.xlane.f32.xlu1 %v5056_v54  ;;  %v5530_v43 = vld [vmem:[#allocation22_spill] sm:$0xff] }
 0x270   : > { %5526 = vst [vmem:[#allocation18_spill] sm:$0xff] %v5058_v41  ;;  %v1364_v19 = vsub.f32 %v4752_v31, %v1295_v36  ;;  %1574 = vadd.xlane.f32.xlu0 %v5058_v41  ;;  %v1263_v25 = vpop.xlane.xlu0 %1262  ;;  %v5064_v50 = vpop.eup %3807 }
 0x271   : > { %3817 = vpow2.f32 %v1456_v0  ;;  %v1348_v47 = vsub.f32 %v4744_v10, %v1263_v25  ;;  %5527 = vst [vmem:[#allocation19_spill] sm:$0xff] %v5064_v50 }
 0x272   : > { %3819 = vpow2.f32 %v1488_v33  ;;  %v1486_v44 = vmul.f32 1.442695, %v1364_v19  ;;  %v5533_v33 = vld [vmem:[#allocation25_spill] sm:$0xff] }
 0x273   : > { %v5066_v59 = vpop.eup %3809  ;;  %v1454_v38 = vmul.f32 1.442695, %v1348_v47  ;;  %v1301_v26 = vpop.xlane.xlu1 %1300  ;;  %1606 = vadd.xlane.f32.xlu1 %v5064_v50 }
 0x274   : > { %5528 = vst [vmem:[#allocation20_spill] sm:$0xff] %v5066_v59  ;;  %v1367_v27 = vsub.f32 %v5529_v22, %v1301_v26  ;;  %1580 = vadd.xlane.f32.xlu0 %v5066_v59  ;;  %v1269_v31 = vpop.xlane.xlu0 %1268  ;;  %v5072_v36 = vpop.eup %3811  ;;  %v5534_v22 = vld [vmem:[#allocation24_spill] sm:$0xff] }
 0x275   : > { %3821 = vpow2.f32 %v1454_v38  ;;  %v1351_v0 = vsub.f32 %v5530_v43, %v1269_v31  ;;  %5531 = vst [vmem:[#allocation21_spill] sm:$0xff] %v5072_v36 }
 0x276   : > { %3823 = vpow2.f32 %v1486_v44  ;;  %v1492_v47 = vmul.f32 1.442695, %v1367_v27 }
 0x277   : > { %v5074_v10 = vpop.eup %3813  ;;  %v1460_v25 = vmul.f32 1.442695, %v1351_v0  ;;  %v1299_v41 = vpop.xlane.xlu1 %1298  ;;  %1612 = vadd.xlane.f32.xlu1 %v5072_v36 }
 0x278   : > { %5532 = vst [vmem:[#allocation23_spill] sm:$0xff] %v5074_v10  ;;  %v1366_v19 = vsub.f32 %v5533_v33, %v1299_v41  ;;  %1578 = vadd.xlane.f32.xlu0 %v5074_v10  ;;  %v1267_v26 = vpop.xlane.xlu0 %1266  ;;  %v5080_v59 = vpop.eup %3815  ;;  %v5537_v33 = vld [vmem:[#allocation27_spill] sm:$0xff] }
 0x279   : > { %3825 = vpow2.f32 %v1460_v25  ;;  %v1350_v38 = vsub.f32 %v5534_v22, %v1267_v26  ;;  %5535 = vst [vmem:[#allocation22_spill] sm:$0xff] %v5080_v59  ;;  %v5538_v22 = vld [vmem:[#allocation29_spill] sm:$0xff] }
 0x27a   : > { %3827 = vpow2.f32 %v1492_v47  ;;  %v1490_v0 = vmul.f32 1.442695, %v1366_v19  ;;  %v5539_v19 = vld [vmem:[#allocation26_spill] sm:$0xff] }
 0x27b   : > { %v5082_v31 = vpop.eup %3817  ;;  %v1458_v43 = vmul.f32 1.442695, %v1350_v38  ;;  %v1305_v50 = vpop.xlane.xlu1 %1304  ;;  %1610 = vadd.xlane.f32.xlu1 %v5080_v59 }
 0x27c   : > { %5536 = vst [vmem:[#allocation25_spill] sm:$0xff] %v5082_v31  ;;  %1584 = vadd.xlane.f32.xlu0 %v5082_v31  ;;  %v1273_v44 = vpop.xlane.xlu0 %1272  ;;  %v5086_v41 = vpop.eup %3819  ;;  %v1369_v26 = vsub.f32 %v5537_v33, %v1305_v50  ;;  %v5540_v31 = vld [vmem:[#allocation28_spill] sm:$0xff] }
 0x27d   : > { %3829 = vpow2.f32 %v1458_v43  ;;  %v1353_v59 = vsub.f32 %v5539_v19, %v1273_v44 }
 0x27e   : > { %3831 = vpow2.f32 %v1490_v0  ;;  %v1496_v0 = vmul.f32 1.442695, %v1369_v26 }
 0x27f   : > { %v5088_v27 = vpop.eup %3821  ;;  %v1303_v25 = vpop.xlane.xlu1 %1302  ;;  %1616 = vadd.xlane.f32.xlu1 %v5086_v41  ;;  %v1464_v50 = vmul.f32 1.442695, %v1353_v59 }
 0x280   : > { %v1368_v38 = vsub.f32 %v5538_v22, %v1303_v25  ;;  %1582 = vadd.xlane.f32.xlu0 %v5088_v27  ;;  %v1271_v47 = vpop.xlane.xlu0 %1270  ;;  %v5096_v43 = vpop.eup %3823 }
 0x281   : > { %v1352_v10 = vsub.f32 %v5540_v31, %v1271_v47 }
 0x282   : > { %v1494_v36 = vmul.f32 1.442695, %v1368_v38 }
 0x283   : > { %v5098_v54 = vpop.eup %3825  ;;  %v1462_v28 = vmul.f32 1.442695, %v1352_v10  ;;  %1614 = vadd.xlane.f32.xlu1 %v5096_v43 }
 0x284   : > { %5541 = vst [vmem:[#allocation24_spill] sm:$0xff] %v5098_v54  ;;  %3833 = vpow2.f32 %v1494_v36  ;;  %1588 = vadd.xlane.f32.xlu0 %v5098_v54  ;;  %v5102_v25 = vpop.eup %3827 }
 0x285   : > { %3835 = vpow2.f32 %v1462_v28  ;;  %5542 = vst [vmem:[#allocation27_spill] sm:$0xff] %v5102_v25 }
 0x286   : > { %3837 = vpow2.f32 %v1496_v0  ;;  %v5549_v0 = vld [vmem:[#allocation30_spill] sm:$0xff] }
 0x287   : > { %v5104_v33 = vpop.eup %3829  ;;  %1620 = vadd.xlane.f32.xlu1 %v5102_v25  ;;  %3839 = vpow2.f32 %v1464_v50  ;;  %v506_v25 = vld [vmem:[%s4830_s27 + $0x128] sm:$0xff] }
 0x288   : > { %5543 = vst [vmem:[#allocation29_spill] sm:$0xff] %v5104_v33  ;;  %1586 = vadd.xlane.f32.xlu0 %v5104_v33  ;;  %v5108_v31 = vpop.eup %3831  ;;  %v505_v33 = vld [vmem:[%s4830_s27 + $0x120] sm:$0xff] }
 0x289   : > { %5544 = vst [vmem:[#allocation26_spill] sm:$0xff] %v5108_v31 }
 0x28b   : > { %1618 = vadd.xlane.f32.xlu1 %v5108_v31  ;;  %v520_v31 = vld [vmem:[%s4830_s27 + $0x198] sm:$0xff] }
 0x28e   : > { %v5111_v10 = vpop.eup %3833 }
 0x28f   : > { %5545 = vst [vmem:[#allocation28_spill] sm:$0xff] %v5111_v10  ;;  %v5113_v36 = vpop.eup %3835  ;;  %1622 = vadd.xlane.f32.xlu1 %v5111_v10  ;;  %v519_v10 = vld [vmem:[%s4830_s27 + $0x190] sm:$0xff] }
 0x290   : > { %5546 = vst [vmem:[#allocation31_spill] sm:$0xff] %v5113_v36  ;;  %1590 = vadd.xlane.f32.xlu0 %v5113_v36  ;;  %v5117_v28 = vpop.eup %3837 }
 0x291   : > { %5547 = vst [vmem:[#allocation32_spill] sm:$0xff] %v5117_v28  ;;  %v5119_v59 = vpop.eup %3839 }
 0x292   : > { %5548 = vst [vmem:[#allocation33_spill] sm:$0xff] %v5119_v59 }
 0x293   : > { %1624 = vadd.xlane.f32.xlu1 %v5117_v28 }
 0x294   : > { %1592 = vadd.xlane.f32.xlu0 %v5119_v59 }
 0x2a0   : > { %v1501_v44 = vpop.xlane.xlu0 %1500 }
 0x2a1   : > { %3841 = vrcp.f32 %v1501_v44 }
 0x2a4   : > { %v1533_v26 = vpop.xlane.xlu1 %1532  ;;  %v1499_v22 = vpop.xlane.xlu0 %1498 }
 0x2a5   : > { %3843 = vrcp.f32 %v1533_v26  ;;  %v503_v26 = vld [vmem:[%s4830_s27 + $0x110] sm:$0xff] }
 0x2a6   : > { %3845 = vrcp.f32 %v1499_v22  ;;  %v504_v22 = vld [vmem:[%s4830_s27 + $0x118] sm:$0xff] }
 0x2a7   : > { %v3588_v59 = vpack.c.bf16 %v504_v22, %v503_v26  ;;  %v3620_v22 = vpack.c.bf16 %v520_v31, %v519_v10  ;;  %v523_v10 = vld [vmem:[%s4830_s27 + $0x1b0] sm:$0xff] }
 0x2a8   : > { %v1531_v38 = vpop.xlane.xlu1 %1530 }
 0x2a9   : > { %3847 = vrcp.f32 %v1531_v38  ;;  %v1505_v47 = vpop.xlane.xlu0 %1504 }
 0x2aa   : > { %3849 = vrcp.f32 %v1505_v47 }
 0x2ab   : > { %v3842_v19 = vpop.eup %3841 }
 0x2ac   : > { %v1691_v50 = vmul.f32 %v3842_v19, %v5549_v0  ;;  %v1537_v36 = vpop.xlane.xlu1 %1536 }
 0x2ad   : > { %3851 = vrcp.f32 %v1537_v36  ;;  %v1503_v28 = vpop.xlane.xlu0 %1502 }
 0x2ae   : > { %2399 = vst [vmem:[%s5125_s24 + $0x8] sm:$0xff] %v1691_v50  ;;  %3853 = vrcp.f32 %v1503_v28 }
 0x2af   : > { %v3844_v44 = vpop.eup %3843 }
 0x2b0   : > { %v3846_v38 = vpop.eup %3845  ;;  %v1707_v47 = vmul.f32 %v3844_v44, %v4848_v53  ;;  %v1535_v19 = vpop.xlane.xlu1 %1534 }
 0x2b1   : > { %3855 = vrcp.f32 %v1535_v19  ;;  %v1509_v36 = vpop.xlane.xlu0 %1508  ;;  %v1690_v0 = vmul.f32 %v3846_v38, %v4842_v34  ;;  %v3592_v38 = vpack.c.bf16 %v506_v25, %v505_v33  ;;  %v521_v19 = vld [vmem:[%s4830_s27 + $0x1a0] sm:$0xff] }
 0x2b2   : > { %2415 = vst [vmem:[%s5125_s24 + $0x88] sm:$0xff] %v1707_v47  ;;  %3857 = vrcp.f32 %v1509_v36 }
 0x2b3   : > { %v3848_v28 = vpop.eup %3847  ;;  %3200 = vmatprep.mubr.f32.mxu0 %v1690_v0  ;;  %2398 = vst [vmem:[%s5125_s24] sm:$0xff] %v1690_v0  ;;  %v508_v0 = vld [vmem:[%s4830_s27 + $0x138] sm:$0xff] }
 0x2b4   : > { %v3850_v54 = vpop.eup %3849  ;;  %3201 = vmatmul.mubr.f32.vlgmr.msra.gmra.mrb[32].mxu0 %v1691_v50  ;;  %v1541_v53 = vpop.xlane.xlu1 %1540  ;;  %v1706_v44 = vmul.f32 %v3848_v28, %v4860_v32  ;;  %v522_v50 = vld [vmem:[%s4830_s27 + $0x1a8] sm:$0xff]  ;;  %v507_v32 = vld [vmem:[%s4830_s27 + $0x130] sm:$0xff] }
 0x2b5   : > { %3859 = vrcp.f32 %v1541_v53  ;;  %v1507_v34 = vpop.xlane.xlu0 %1506  ;;  %v1693_v26 = vmul.f32 %v3850_v54, %v4862_v57  ;;  %3587 = vmatpush3.bf16.msra.mxu0 %v4997_v12  ;;  %v3624_v33 = vpack.c.bf16 %v522_v50, %v521_v19  ;;  %v3596_v31 = vpack.c.bf16 %v508_v0, %v507_v32  ;;  %v525_v32 = vld [vmem:[%s4830_s27 + $0x1c0] sm:$0xff] }
 0x2b6   : > { %3861 = vrcp.f32 %v1507_v34  ;;  %3256 = vmatprep.mubr.f32.mxu1 %v1706_v44  ;;  %2414 = vst [vmem:[%s5125_s24 + $0x80] sm:$0xff] %v1706_v44  ;;  %3589 = vmatprep.subr.bf16.mxu0 %v3588_v59 }
 0x2b7   : > { %v3852_v36 = vpop.eup %3851  ;;  %3257 = vmatmul.mubr.f32.vlgmr.msra.gmra.mrb[32].mxu1 %v1707_v47  ;;  %2401 = vst [vmem:[%s5125_s24 + $0x18] sm:$0xff] %v1693_v26  ;;  %v524_v47 = vld [vmem:[%s4830_s27 + $0x1b8] sm:$0xff] }
 0x2b8   : > { %v3854_v28 = vpop.eup %3853  ;;  %v1539_v57 = vpop.xlane.xlu1 %1538  ;;  %v1709_v12 = vmul.f32 %v3852_v36, %v4868_v37  ;;  %3619 = vmatpush3.bf16.msra.mxu1 %v5007_v60  ;;  %v509_v37 = vld [vmem:[%s4830_s27 + $0x140] sm:$0xff]  ;;  %v510_v60 = vld [vmem:[%s4830_s27 + $0x148] sm:$0xff]  ;;  %v3628_v50 = vpack.c.bf16 %v524_v47, %v523_v10  ;;  %v527_v10 = vld [vmem:[%s4830_s27 + $0x1d0] sm:$0xff] }
 0x2b9   : > { %3863 = vrcp.f32 %v1539_v57  ;;  %v1513_v54 = vpop.xlane.xlu0 %1512  ;;  %v1692_v25 = vmul.f32 %v3854_v28, %v4870_v39  ;;  %3591 = vmatpush3.bf16.msra.mxu0 %v3588_v59  ;;  %3621 = vmatprep.subr.bf16.mxu1 %v3620_v22  ;;  %v3600_v36 = vpack.c.bf16 %v510_v60, %v509_v37  ;;  %v528_v47 = vld [vmem:[%s4830_s27 + $0x1d8] sm:$0xff] }
 0x2ba   : > { %3865 = vrcp.f32 %v1513_v54  ;;  %2417 = vst [vmem:[%s5125_s24 + $0x98] sm:$0xff] %v1709_v12  ;;  %3593 = vmatprep.subr.bf16.mxu0 %v3592_v38 }
 0x2bb   : > { %v3856_v53 = vpop.eup %3855  ;;  %3203 = vmatprep.mubr.f32.mxu0 %v1692_v25  ;;  %2400 = vst [vmem:[%s5125_s24 + $0x10] sm:$0xff] %v1692_v25 }
 0x2bc   : > { %v3858_v44 = vpop.eup %3857  ;;  %v1545_v34 = vpop.xlane.xlu1 %1544  ;;  %3204 = vmatmul.mubr.f32.gmra.mrb[34].mxu0 %v1693_v26  ;;  %v1708_v39 = vmul.f32 %v3856_v53, %v4880_v55  ;;  %3623 = vmatpush3.bf16.msra.mxu1 %v3620_v22  ;;  %v526_v26 = vld [vmem:[%s4830_s27 + $0x1c8] sm:$0xff]  ;;  %v511_v55 = vld [vmem:[%s4830_s27 + $0x150] sm:$0xff]  ;;  %v512_v22 = vld [vmem:[%s4830_s27 + $0x158] sm:$0xff] }
 0x2bd   : > { %3867 = vrcp.f32 %v1545_v34  ;;  %v1511_v59 = vpop.xlane.xlu0 %1510  ;;  %v1695_v19 = vmul.f32 %v3858_v44, %v4882_v16  ;;  %3595 = vmatpush3.bf16.msra.mxu0 %v3592_v38  ;;  %3625 = vmatprep.subr.bf16.mxu1 %v3624_v33  ;;  %v3604_v25 = vpack.c.bf16 %v512_v22, %v511_v55  ;;  %v3636_v34 = vpack.c.bf16 %v528_v47, %v527_v10 }
 0x2be   : > { %3869 = vrcp.f32 %v1511_v59  ;;  %3259 = vmatprep.mubr.f32.mxu1 %v1708_v39  ;;  %2416 = vst [vmem:[%s5125_s24 + $0x90] sm:$0xff] %v1708_v39  ;;  %3597 = vmatprep.subr.bf16.mxu0 %v3596_v31  ;;  %v529_v59 = vld [vmem:[%s4830_s27 + $0x1e0] sm:$0xff] }
 0x2bf   : > { %v3860_v0 = vpop.eup %3859  ;;  %3260 = vmatmul.mubr.f32.gmra.mrb[34].mxu1 %v1709_v12  ;;  %2403 = vst [vmem:[%s5125_s24 + $0x28] sm:$0xff] %v1695_v19  ;;  %v3632_v12 = vpack.c.bf16 %v526_v26, %v525_v32 }
 0x2c0   : > { %v3862_v28 = vpop.eup %3861  ;;  %v1543_v16 = vpop.xlane.xlu1 %1542  ;;  %v1711_v38 = vmul.f32 %v3860_v0, %v4891_v63  ;;  %3627 = vmatpush3.bf16.msra.mxu1 %v3624_v33  ;;  %v513_v63 = vld [vmem:[%s4830_s27 + $0x160] sm:$0xff]  ;;  %v514_v33 = vld [vmem:[%s4830_s27 + $0x168] sm:$0xff] }
 0x2c1   : > { %3871 = vrcp.f32 %v1543_v16  ;;  %v1517_v57 = vpop.xlane.xlu0 %1516  ;;  %v1694_v54 = vmul.f32 %v3862_v28, %v4894_v48  ;;  %3599 = vmatpush3.bf16.msra.mxu0 %v3596_v31  ;;  %3629 = vmatprep.subr.bf16.mxu1 %v3628_v50  ;;  %v3608_v39 = vpack.c.bf16 %v514_v33, %v513_v63  ;;  %v531_v16 = vld [vmem:[%s4830_s27 + $0x1f0] sm:$0xff] }
 0x2c2   : > { %3873 = vrcp.f32 %v1517_v57  ;;  %2419 = vst [vmem:[%s5125_s24 + $0xa8] sm:$0xff] %v1711_v38  ;;  %3601 = vmatprep.subr.bf16.mxu0 %v3600_v36 }
 0x2c3   : > { %v3864_v53 = vpop.eup %3863  ;;  %3206 = vmatprep.mubr.f32.mxu0 %v1694_v54  ;;  %2402 = vst [vmem:[%s5125_s24 + $0x20] sm:$0xff] %v1694_v54 }
 0x2c4   : > { %v3866_v37 = vpop.eup %3865  ;;  %v1549_v60 = vpop.xlane.xlu1 %1548  ;;  %3207 = vmatmul.mubr.f32.gmra.mrb[36].mxu0 %v1695_v19  ;;  %v1710_v48 = vmul.f32 %v3864_v53, %v4903_v62  ;;  %3631 = vmatpush3.bf16.msra.mxu1 %v3628_v50  ;;  %v530_v19 = vld [vmem:[%s4830_s27 + $0x1e8] sm:$0xff]  ;;  %v515_v62 = vld [vmem:[%s4830_s27 + $0x170] sm:$0xff]  ;;  %v516_v50 = vld [vmem:[%s4830_s27 + $0x178] sm:$0xff] }
 0x2c5   : > { %3875 = vrcp.f32 %v1549_v60  ;;  %v1515_v31 = vpop.xlane.xlu0 %1514  ;;  %v1697_v44 = vmul.f32 %v3866_v37, %v4906_v15  ;;  %3603 = vmatpush3.bf16.msra.mxu0 %v3600_v36  ;;  %3633 = vmatprep.subr.bf16.mxu1 %v3632_v12  ;;  %v3640_v22 = vpack.c.bf16 %v530_v19, %v529_v59  ;;  %v3612_v28 = vpack.c.bf16 %v516_v50, %v515_v62 }
 0x2c6   : > { %3877 = vrcp.f32 %v1515_v31  ;;  %3262 = vmatprep.mubr.f32.mxu1 %v1710_v48  ;;  %2418 = vst [vmem:[%s5125_s24 + $0xa0] sm:$0xff] %v1710_v48  ;;  %3605 = vmatprep.subr.bf16.mxu0 %v3604_v25 }
 0x2c7   : > { %v3868_v32 = vpop.eup %3867  ;;  %3263 = vmatmul.mubr.f32.gmra.mrb[36].mxu1 %v1711_v38  ;;  %2405 = vst [vmem:[%s5125_s24 + $0x38] sm:$0xff] %v1697_v44  ;;  %v532_v38 = vld [vmem:[%s4830_s27 + $0x1f8] sm:$0xff] }
 0x2c8   : > { %v3870_v26 = vpop.eup %3869  ;;  %v1547_v15 = vpop.xlane.xlu1 %1546  ;;  %v1713_v36 = vmul.f32 %v3868_v32, %v4915_v17  ;;  %3635 = vmatpush3.bf16.msra.mxu1 %v3632_v12  ;;  %v3644_v10 = vpack.c.bf16 %v532_v38, %v531_v16 }
 0x2c9   : > { %3879 = vrcp.f32 %v1547_v15  ;;  %v1521_v0 = vpop.xlane.xlu0 %1520  ;;  %v1696_v55 = vmul.f32 %v3870_v26, %v4918_v18  ;;  %3607 = vmatpush3.bf16.msra.mxu0 %v3604_v25  ;;  %3637 = vmatprep.subr.bf16.mxu1 %v3636_v34 }
 0x2ca   : > { %3881 = vrcp.f32 %v1521_v0  ;;  %2421 = vst [vmem:[%s5125_s24 + $0xb8] sm:$0xff] %v1713_v36  ;;  %3609 = vmatprep.subr.bf16.mxu0 %v3608_v39 }
 0x2cb   : > { %v3872_v57 = vpop.eup %3871  ;;  %3209 = vmatprep.mubr.f32.mxu0 %v1696_v55  ;;  %2404 = vst [vmem:[%s5125_s24 + $0x30] sm:$0xff] %v1696_v55 }
 0x2cc   : > { %v3874_v17 = vpop.eup %3873  ;;  %v1553_v54 = vpop.xlane.xlu1 %1552  ;;  %3210 = vmatmul.mubr.f32.gmra.mrb[38].mxu0 %v1697_v44  ;;  %v1712_v12 = vmul.f32 %v3872_v57, %v4926_v52  ;;  %3639 = vmatpush3.bf16.msra.mxu1 %v3636_v34 }
 0x2cd   : > { %3883 = vrcp.f32 %v1553_v54  ;;  %v1519_v18 = vpop.xlane.xlu0 %1518  ;;  %v1699_v25 = vmul.f32 %v3874_v17, %v4928_v14  ;;  %3611 = vmatpush3.bf16.msra.mxu0 %v3608_v39  ;;  %3641 = vmatprep.subr.bf16.mxu1 %v3640_v22 }
 0x2ce   : > { %3885 = vrcp.f32 %v1519_v18  ;;  %3265 = vmatprep.mubr.f32.mxu1 %v1712_v12  ;;  %2420 = vst [vmem:[%s5125_s24 + $0xb0] sm:$0xff] %v1712_v12  ;;  %3613 = vmatprep.subr.bf16.mxu0 %v3612_v28 }
 0x2cf   : > { %v3876_v47 = vpop.eup %3875  ;;  %3266 = vmatmul.mubr.f32.gmra.mrb[38].mxu1 %v1713_v36  ;;  %2407 = vst [vmem:[%s5125_s24 + $0x48] sm:$0xff] %v1699_v25 }
 0x2d0   : > { %v3878_v53 = vpop.eup %3877  ;;  %v1551_v63 = vpop.xlane.xlu1 %1550  ;;  %v1715_v52 = vmul.f32 %v3876_v47, %v4934_v1  ;;  %3643 = vmatpush3.bf16.msra.mxu1 %v3640_v22 }
 0x2d1   : > { %3887 = vrcp.f32 %v1551_v63  ;;  %v1525_v33 = vpop.xlane.xlu0 %1524  ;;  %v1698_v14 = vmul.f32 %v3878_v53, %v4936_v5  ;;  %3615 = vmatpush3.bf16.msra.mxu0 %v3612_v28  ;;  %3645 = vmatprep.subr.bf16.mxu1 %v3644_v10 }
 0x2d2   : > { %3889 = vrcp.f32 %v1525_v33  ;;  %2423 = vst [vmem:[%s5125_s24 + $0xc8] sm:$0xff] %v1715_v52 }
 0x2d3   : > { %v3880_v37 = vpop.eup %3879  ;;  %3212 = vmatprep.mubr.f32.mxu0 %v1698_v14  ;;  %2406 = vst [vmem:[%s5125_s24 + $0x40] sm:$0xff] %v1698_v14 }
 0x2d4   : > { %v3882_v60 = vpop.eup %3881  ;;  %v1557_v48 = vpop.xlane.xlu1 %1556  ;;  %3213 = vmatmul.mubr.f32.gmra.mrb[40].mxu0 %v1699_v25  ;;  %v1714_v31 = vmul.f32 %v3880_v37, %v4942_v8  ;;  %3647 = vmatpush3.bf16.msra.mxu1 %v3644_v10 }
 0x2d5   : > { %3891 = vrcp.f32 %v1557_v48  ;;  %v1523_v1 = vpop.xlane.xlu0 %1522  ;;  %v1701_v5 = vmul.f32 %v3882_v60, %v4944_v11 }
 0x2d6   : > { %3893 = vrcp.f32 %v1523_v1  ;;  %3268 = vmatprep.mubr.f32.mxu1 %v1714_v31  ;;  %2422 = vst [vmem:[%s5125_s24 + $0xc0] sm:$0xff] %v1714_v31 }
 0x2d7   : > { %v3884_v44 = vpop.eup %3883  ;;  %3269 = vmatmul.mubr.f32.gmra.mrb[40].mxu1 %v1715_v52  ;;  %2409 = vst [vmem:[%s5125_s24 + $0x58] sm:$0xff] %v1701_v5 }
 0x2d8   : > { %v3886_v34 = vpop.eup %3885  ;;  %v1555_v39 = vpop.xlane.xlu1 %1554  ;;  %v1717_v59 = vmul.f32 %v3884_v44, %v4950_v40 }
 0x2d9   : > { %3895 = vrcp.f32 %v1555_v39  ;;  %v1529_v19 = vpop.xlane.xlu0 %1528  ;;  %v1700_v8 = vmul.f32 %v3886_v34, %v4952_v3 }
 0x2da   : > { %3897 = vrcp.f32 %v1529_v19  ;;  %2425 = vst [vmem:[%s5125_s24 + $0xd8] sm:$0xff] %v1717_v59 }
 0x2db   : > { %v3888_v11 = vpop.eup %3887  ;;  %3215 = vmatprep.mubr.f32.mxu0 %v1700_v8  ;;  %2408 = vst [vmem:[%s5125_s24 + $0x50] sm:$0xff] %v1700_v8 }
 0x2dc   : > { %v3890_v32 = vpop.eup %3889  ;;  %v1561_v62 = vpop.xlane.xlu1 %1560  ;;  %3216 = vmatmul.mubr.f32.gmra.mrb[42].mxu0 %v1701_v5  ;;  %v1716_v50 = vmul.f32 %v3888_v11, %v4958_v9 }
 0x2dd   : > { %3899 = vrcp.f32 %v1561_v62  ;;  %v1527_v26 = vpop.xlane.xlu0 %1526  ;;  %v1703_v40 = vmul.f32 %v3890_v32, %v4960_v58 }
 0x2de   : > { %3901 = vrcp.f32 %v1527_v26  ;;  %3271 = vmatprep.mubr.f32.mxu1 %v1716_v50  ;;  %2424 = vst [vmem:[%s5125_s24 + $0xd0] sm:$0xff] %v1716_v50 }
 0x2df   : > { %v3892_v3 = vpop.eup %3891  ;;  %3272 = vmatmul.mubr.f32.gmra.mrb[42].mxu1 %v1717_v59  ;;  %2411 = vst [vmem:[%s5125_s24 + $0x68] sm:$0xff] %v1703_v40 }
 0x2e0   : > { %v3894_v15 = vpop.eup %3893  ;;  %v1559_v36 = vpop.xlane.xlu1 %1558  ;;  %v1719_v0 = vmul.f32 %v3892_v3, %v4966_v49 }
 0x2e1   : > { %3903 = vrcp.f32 %v1559_v36  ;;  %v1565_v55 = vpop.xlane.xlu0 %1564  ;;  %v1702_v9 = vmul.f32 %v3894_v15, %v4968_v21 }
 0x2e2   : > { %3905 = vrcp.f32 %v1565_v55  ;;  %2427 = vst [vmem:[%s5125_s24 + $0xe8] sm:$0xff] %v1719_v0  ;;  %v5551_v55 = vld [vmem:[#allocation17_spill] sm:$0xff] }
 0x2e3   : > { %v3896_v58 = vpop.eup %3895  ;;  %3218 = vmatprep.mubr.f32.mxu0 %v1702_v9  ;;  %2410 = vst [vmem:[%s5125_s24 + $0x60] sm:$0xff] %v1702_v9 }
 0x2e4   : > { %v3898_v22 = vpop.eup %3897  ;;  %v1597_v28 = vpop.xlane.xlu1 %1596  ;;  %3219 = vmatmul.mubr.f32.gmra.mrb[44].mxu0 %v1703_v40  ;;  %v1718_v16 = vmul.f32 %v3896_v58, %v4974_v35 }
 0x2e5   : > { %3907 = vrcp.f32 %v1597_v28  ;;  %v1563_v38 = vpop.xlane.xlu0 %1562  ;;  %v1705_v49 = vmul.f32 %v3898_v22, %v4976_v20  ;;  %v5552_v22 = vld [vmem:[#allocation18_spill] sm:$0xff] }
 0x2e6   : > { %3909 = vrcp.f32 %v1563_v38  ;;  %3274 = vmatprep.mubr.f32.mxu1 %v1718_v16  ;;  %2426 = vst [vmem:[%s5125_s24 + $0xe0] sm:$0xff] %v1718_v16 }
 0x2e7   : > { %v3900_v21 = vpop.eup %3899  ;;  %3275 = vmatmul.mubr.f32.gmra.mrb[44].mxu1 %v1719_v0  ;;  %2413 = vst [vmem:[%s5125_s24 + $0x78] sm:$0xff] %v1705_v49 }
 0x2e8   : > { %v3902_v57 = vpop.eup %3901  ;;  %v1595_v17 = vpop.xlane.xlu1 %1594  ;;  %v1721_v54 = vmul.f32 %v3900_v21, %v4982_v2 }
 0x2e9   : > { %3911 = vrcp.f32 %v1595_v17  ;;  %v1569_v12 = vpop.xlane.xlu0 %1568  ;;  %v1704_v35 = vmul.f32 %v3902_v57, %v4984_v29  ;;  %v5554_v17 = vld [vmem:[#allocation20_spill] sm:$0xff] }
 0x2ea   : > { %3913 = vrcp.f32 %v1569_v12  ;;  %2429 = vst [vmem:[%s5125_s24 + $0xf8] sm:$0xff] %v1721_v54 }
 0x2eb   : > { %v3904_v20 = vpop.eup %3903  ;;  %3221 = vmatprep.mubr.f32.mxu0 %v1704_v35  ;;  %2412 = vst [vmem:[%s5125_s24 + $0x70] sm:$0xff] %v1704_v35 }
 0x2ec   : > { %v3906_v18 = vpop.eup %3905  ;;  %v1601_v25 = vpop.xlane.xlu1 %1600  ;;  %3222 = vmatmul.mubr.f32.gmra.mrb[46].mxu0 %v1705_v49  ;;  %v1720_v10 = vmul.f32 %v3904_v20, %v4990_v6  ;;  %v5553_v49 = vld [vmem:[#allocation19_spill] sm:$0xff] }
 0x2ed   : > { %v1723_v47 = vmul.f32 %v3906_v18, %v4994_v13  ;;  %3915 = vrcp.f32 %v1601_v25  ;;  %v1567_v2 = vpop.xlane.xlu0 %1566  ;;  %v5555_v18 = vld [vmem:[#allocation21_spill] sm:$0xff] }
 0x2ee   : > { %3917 = vrcp.f32 %v1567_v2  ;;  %3277 = vmatprep.mubr.f32.mxu1 %v1720_v10  ;;  %2428 = vst [vmem:[%s5125_s24 + $0xf0] sm:$0xff] %v1720_v10 }
 0x2ef   : > { %v3908_v29 = vpop.eup %3907  ;;  %2431 = vst [vmem:[%s5125_s24 + $0x108] sm:$0xff] %v1723_v47  ;;  %3278 = vmatmul.mubr.f32.gmra.mrb[46].mxu1 %v1721_v54 }
 0x2f0   : > { %v3910_v53 = vpop.eup %3909  ;;  %v1739_v63 = vmul.f32 %v3908_v29, %v5005_v56  ;;  %v1599_v52 = vpop.xlane.xlu1 %1598 }
 0x2f1   : > { %3919 = vrcp.f32 %v1599_v52  ;;  %v1573_v33 = vpop.xlane.xlu0 %1572  ;;  %v1722_v6 = vmul.f32 %v3910_v53, %v5009_v45  ;;  %v5557_v52 = vld [vmem:[#allocation22_spill] sm:$0xff] }
 0x2f2   : > { %2447 = vst [vmem:[%s5125_s24 + $0x188] sm:$0xff] %v1739_v63  ;;  %3921 = vrcp.f32 %v1573_v33 }
 0x2f3   : > { %v3912_v13 = vpop.eup %3911  ;;  %3312 = vmatprep.mubr.f32.mxu0 %v1722_v6  ;;  %2430 = vst [vmem:[%s5125_s24 + $0x100] sm:$0xff] %v1722_v6 }
 0x2f4   : > { %v3914_v14 = vpop.eup %3913  ;;  %v1605_v37 = vpop.xlane.xlu1 %1604  ;;  %3313 = vmatmul.mubr.f32.vlgmr.msra.gmra.mrb[48].mxu0 %v1723_v47  ;;  %v1738_v60 = vmul.f32 %v3912_v13, %v5016_v46  ;;  %v5556_v47 = vld [vmem:[#allocation23_spill] sm:$0xff]  ;;  %v5558_v13 = vld [vmem:[#allocation25_spill] sm:$0xff] }
 0x2f5   : > { %3923 = vrcp.f32 %v1605_v37  ;;  %v1571_v56 = vpop.xlane.xlu0 %1570  ;;  %v1725_v48 = vmul.f32 %v3914_v14, %v5018_v42 }
 0x2f6   : > { %3925 = vrcp.f32 %v1571_v56  ;;  %3368 = vmatprep.mubr.f32.mxu1 %v1738_v60  ;;  %2446 = vst [vmem:[%s5125_s24 + $0x180] sm:$0xff] %v1738_v60 }
 0x2f7   : > { %v3916_v45 = vpop.eup %3915  ;;  %3369 = vmatmul.mubr.f32.vlgmr.msra.gmra.mrb[48].mxu1 %v1739_v63  ;;  %2433 = vst [vmem:[%s5125_s24 + $0x118] sm:$0xff] %v1725_v48 }
 0x2f8   : > { %v3918_v31 = vpop.eup %3917  ;;  %v1603_v1 = vpop.xlane.xlu1 %1602  ;;  %v1741_v5 = vmul.f32 %v3916_v45, %v5024_v7 }
 0x2f9   : > { %3927 = vrcp.f32 %v1603_v1  ;;  %v1577_v44 = vpop.xlane.xlu0 %1576  ;;  %v1724_v46 = vmul.f32 %v3918_v31, %v5026_v51 }
 0x2fa   : > { %3929 = vrcp.f32 %v1577_v44  ;;  %2449 = vst [vmem:[%s5125_s24 + $0x198] sm:$0xff] %v1741_v5 }
 0x2fb   : > { %v3920_v42 = vpop.eup %3919  ;;  %3315 = vmatprep.mubr.f32.mxu0 %v1724_v46  ;;  %2432 = vst [vmem:[%s5125_s24 + $0x110] sm:$0xff] %v1724_v46 }
 0x2fc   : > { %v3922_v34 = vpop.eup %3921  ;;  %v1609_v39 = vpop.xlane.xlu1 %1608  ;;  %3316 = vmatmul.mubr.f32.gmra.mrb[50].mxu0 %v1725_v48  ;;  %v1740_v59 = vmul.f32 %v3920_v42, %v5032_v23  ;;  %v5559_v42 = vld [vmem:[#allocation24_spill] sm:$0xff] }
 0x2fd   : > { %3931 = vrcp.f32 %v1609_v39  ;;  %v1575_v19 = vpop.xlane.xlu0 %1574  ;;  %v1727_v7 = vmul.f32 %v3922_v34, %v5034_v61 }
 0x2fe   : > { %3933 = vrcp.f32 %v1575_v19  ;;  %3371 = vmatprep.mubr.f32.mxu1 %v1740_v59  ;;  %2448 = vst [vmem:[%s5125_s24 + $0x190] sm:$0xff] %v1740_v59  ;;  %v5560_v59 = vld [vmem:[#allocation27_spill] sm:$0xff] }
 0x2ff   : > { %v3924_v51 = vpop.eup %3923  ;;  %3372 = vmatmul.mubr.f32.gmra.mrb[50].mxu1 %v1741_v5  ;;  %2435 = vst [vmem:[%s5125_s24 + $0x128] sm:$0xff] %v1727_v7 }
 0x300   : > { %v3926_v8 = vpop.eup %3925  ;;  %v1607_v11 = vpop.xlane.xlu1 %1606  ;;  %v1743_v32 = vmul.f32 %v3924_v51, %v5040_v24  ;;  %v5550_v24 = vld [vmem:[#allocation16_spill] sm:$0xff] }
 0x301   : > { %3935 = vrcp.f32 %v1607_v11  ;;  %v1581_v62 = vpop.xlane.xlu0 %1580  ;;  %v1726_v23 = vmul.f32 %v3926_v8, %v5042_v4  ;;  %v5562_v11 = vld [vmem:[#allocation26_spill] sm:$0xff] }
 0x302   : > { %3937 = vrcp.f32 %v1581_v62  ;;  %2451 = vst [vmem:[%s5125_s24 + $0x1a8] sm:$0xff] %v1743_v32 }
 0x303   : > { %v3928_v61 = vpop.eup %3927  ;;  %3318 = vmatprep.mubr.f32.mxu0 %v1726_v23  ;;  %2434 = vst [vmem:[%s5125_s24 + $0x120] sm:$0xff] %v1726_v23 }
 0x304   : > { %v3930_v50 = vpop.eup %3929  ;;  %v1613_v26 = vpop.xlane.xlu1 %1612  ;;  %3319 = vmatmul.mubr.f32.gmra.mrb[52].mxu0 %v1727_v7  ;;  %v1742_v40 = vmul.f32 %v3928_v61, %v5048_v30  ;;  %v5563_v61 = vld [vmem:[#allocation28_spill] sm:$0xff] }
 0x305   : > { %3939 = vrcp.f32 %v1613_v26  ;;  %v1579_v3 = vpop.xlane.xlu0 %1578  ;;  %v1729_v15 = vmul.f32 %v3930_v50, %v5550_v24  ;;  %v5564_v26 = vld [vmem:[#allocation31_spill] sm:$0xff] }
 0x306   : > { %3941 = vrcp.f32 %v1579_v3  ;;  %3374 = vmatprep.mubr.f32.mxu1 %v1742_v40  ;;  %2450 = vst [vmem:[%s5125_s24 + $0x1a0] sm:$0xff] %v1742_v40 }
 0x307   : > { %v3932_v4 = vpop.eup %3931  ;;  %3375 = vmatmul.mubr.f32.gmra.mrb[52].mxu1 %v1743_v32  ;;  %2437 = vst [vmem:[%s5125_s24 + $0x138] sm:$0xff] %v1729_v15 }
 0x308   : > { %v3934_v36 = vpop.eup %3933  ;;  %v1611_v0 = vpop.xlane.xlu1 %1610  ;;  %v1745_v9 = vmul.f32 %v3932_v4, %v5551_v55 }
 0x309   : > { %3943 = vrcp.f32 %v1611_v0  ;;  %v1585_v58 = vpop.xlane.xlu0 %1584  ;;  %v1728_v30 = vmul.f32 %v3934_v36, %v5552_v22  ;;  %v5566_v36 = vld [vmem:[#allocation33_spill] sm:$0xff] }
 0x30a   : > { %3945 = vrcp.f32 %v1585_v58  ;;  %2453 = vst [vmem:[%s5125_s24 + $0x1b8] sm:$0xff] %v1745_v9 }
 0x30b   : > { %v3936_v28 = vpop.eup %3935  ;;  %3321 = vmatprep.mubr.f32.mxu0 %v1728_v30  ;;  %2436 = vst [vmem:[%s5125_s24 + $0x130] sm:$0xff] %v1728_v30 }
 0x30c   : > { %v3938_v16 = vpop.eup %3937  ;;  %v1617_v38 = vpop.xlane.xlu1 %1616  ;;  %3322 = vmatmul.mubr.f32.gmra.mrb[54].mxu0 %v1729_v15  ;;  %v1744_v21 = vmul.f32 %v3936_v28, %v5553_v49  ;;  %v5565_v15 = vld [vmem:[#allocation32_spill] sm:$0xff] }
 0x30d   : > { %3947 = vrcp.f32 %v1617_v38  ;;  %v1583_v57 = vpop.xlane.xlu0 %1582  ;;  %v1731_v54 = vmul.f32 %v3938_v16, %v5554_v17 }
 0x30e   : > { %3949 = vrcp.f32 %v1583_v57  ;;  %3377 = vmatprep.mubr.f32.mxu1 %v1744_v21  ;;  %2452 = vst [vmem:[%s5125_s24 + $0x1b0] sm:$0xff] %v1744_v21 }
 0x30f   : > { %v3940_v12 = vpop.eup %3939  ;;  %3378 = vmatmul.mubr.f32.gmra.mrb[54].mxu1 %v1745_v9  ;;  %2439 = vst [vmem:[%s5125_s24 + $0x148] sm:$0xff] %v1731_v54 }
 0x310   : > { %v3942_v35 = vpop.eup %3941  ;;  %v1615_v20 = vpop.xlane.xlu1 %1614  ;;  %v1747_v25 = vmul.f32 %v3940_v12, %v5555_v18 }
 0x311   : > { %3951 = vrcp.f32 %v1615_v20  ;;  %v1589_v10 = vpop.xlane.xlu0 %1588  ;;  %v1730_v2 = vmul.f32 %v3942_v35, %v5556_v47 }
 0x312   : > { %3953 = vrcp.f32 %v1589_v10  ;;  %2455 = vst [vmem:[%s5125_s24 + $0x1c8] sm:$0xff] %v1747_v25 }
 0x313   : > { %v3944_v29 = vpop.eup %3943  ;;  %3324 = vmatprep.mubr.f32.mxu0 %v1730_v2  ;;  %2438 = vst [vmem:[%s5125_s24 + $0x140] sm:$0xff] %v1730_v2 }
 0x314   : > { %v3946_v53 = vpop.eup %3945  ;;  %v1621_v63 = vpop.xlane.xlu1 %1620  ;;  %3325 = vmatmul.mubr.f32.gmra.mrb[56].mxu0 %v1731_v54  ;;  %v1746_v33 = vmul.f32 %v3944_v29, %v5557_v52 }
 0x315   : > { %3955 = vrcp.f32 %v1621_v63  ;;  %v1587_v6 = vpop.xlane.xlu0 %1586  ;;  %v1733_v14 = vmul.f32 %v3946_v53, %v5558_v13 }
 0x316   : > { %3957 = vrcp.f32 %v1587_v6  ;;  %3380 = vmatprep.mubr.f32.mxu1 %v1746_v33  ;;  %2454 = vst [vmem:[%s5125_s24 + $0x1c0] sm:$0xff] %v1746_v33 }
 0x317   : > { %v3948_v37 = vpop.eup %3947  ;;  %3381 = vmatmul.mubr.f32.gmra.mrb[56].mxu1 %v1747_v25  ;;  %2441 = vst [vmem:[%s5125_s24 + $0x158] sm:$0xff] %v1733_v14 }
 0x318   : > { %v3950_v60 = vpop.eup %3949  ;;  %v1619_v56 = vpop.xlane.xlu1 %1618  ;;  %v1749_v48 = vmul.f32 %v3948_v37, %v5086_v41 }
 0x319   : > { %3959 = vrcp.f32 %v1619_v56  ;;  %v1732_v45 = vmul.f32 %v3950_v60, %v5088_v27 }
 0x31a   : > { %2457 = vst [vmem:[%s5125_s24 + $0x1d8] sm:$0xff] %v1749_v48 }
 0x31b   : > { %v3952_v31 = vpop.eup %3951  ;;  %3327 = vmatprep.mubr.f32.mxu0 %v1732_v45  ;;  %2440 = vst [vmem:[%s5125_s24 + $0x150] sm:$0xff] %v1732_v45 }
 0x31c   : > { %v3954_v1 = vpop.eup %3953  ;;  %v1623_v5 = vpop.xlane.xlu1 %1622  ;;  %3328 = vmatmul.mubr.f32.gmra.mrb[58].mxu0 %v1733_v14  ;;  %v1748_v44 = vmul.f32 %v3952_v31, %v5096_v43  ;;  %v5561_v43 = vld [vmem:[#allocation29_spill] sm:$0xff] }
 0x31d   : > { %3961 = vrcp.f32 %v1623_v5  ;;  %v1591_v46 = vpop.xlane.xlu0 %1590  ;;  %v1735_v34 = vmul.f32 %v3954_v1, %v5559_v42 }
 0x31e   : > { %3963 = vrcp.f32 %v1591_v46  ;;  %3383 = vmatprep.mubr.f32.mxu1 %v1748_v44  ;;  %2456 = vst [vmem:[%s5125_s24 + $0x1d0] sm:$0xff] %v1748_v44 }
 0x31f   : > { %v3956_v41 = vpop.eup %3955  ;;  %3384 = vmatmul.mubr.f32.gmra.mrb[58].mxu1 %v1749_v48  ;;  %2443 = vst [vmem:[%s5125_s24 + $0x168] sm:$0xff] %v1735_v34 }
 0x320   : > { %v3958_v27 = vpop.eup %3957  ;;  %v1625_v39 = vpop.xlane.xlu1 %1624  ;;  %v1751_v19 = vmul.f32 %v3956_v41, %v5560_v59 }
 0x321   : > { %3965 = vrcp.f32 %v1625_v39  ;;  %v1593_v7 = vpop.xlane.xlu0 %1592  ;;  %v1734_v51 = vmul.f32 %v3958_v27, %v5561_v43 }
 0x322   : > { %3967 = vrcp.f32 %v1593_v7  ;;  %2459 = vst [vmem:[%s5125_s24 + $0x1e8] sm:$0xff] %v1751_v19 }
 0x323   : > { %v3960_v8 = vpop.eup %3959  ;;  %3330 = vmatprep.mubr.f32.mxu0 %v1734_v51  ;;  %2442 = vst [vmem:[%s5125_s24 + $0x160] sm:$0xff] %v1734_v51 }
 0x324   : > { %3331 = vmatmul.mubr.f32.gmra.mrb[60].mxu0 %v1735_v34  ;;  %v1750_v32 = vmul.f32 %v3960_v8, %v5562_v11 }
 0x326   : > { %3386 = vmatprep.mubr.f32.mxu1 %v1750_v32  ;;  %2458 = vst [vmem:[%s5125_s24 + $0x1e0] sm:$0xff] %v1750_v32 }
 0x327   : > { %v3962_v62 = vpop.eup %3961  ;;  %3387 = vmatmul.mubr.f32.gmra.mrb[60].mxu1 %v1751_v19 }
 0x328   : > { %v3964_v23 = vpop.eup %3963  ;;  %v1752_v50 = vmul.f32 %v3962_v62, %v5563_v61 }
 0x329   : > { %v1736_v40 = vmul.f32 %v3964_v23, %v5564_v26 }
 0x32a   : > { %3389 = vmatprep.mubr.f32.mxu1 %v1752_v50  ;;  %2460 = vst [vmem:[%s5125_s24 + $0x1f0] sm:$0xff] %v1752_v50 }
 0x32b   : > { %v3966_v3 = vpop.eup %3965  ;;  %3333 = vmatprep.mubr.f32.mxu0 %v1736_v40  ;;  %2444 = vst [vmem:[%s5125_s24 + $0x170] sm:$0xff] %v1736_v40 }
 0x32c   : > { %v3968_v24 = vpop.eup %3967  ;;  %v1753_v4 = vmul.f32 %v3966_v3, %v5565_v15 }
 0x32d   : > { %v1737_v0 = vmul.f32 %v3968_v24, %v5566_v36 }
 0x32e   : > { %3390 = vmatmul.mubr.f32.gmra.mrb[62].mxu1 %v1753_v4  ;;  %2461 = vst [vmem:[%s5125_s24 + $0x1f8] sm:$0xff] %v1753_v4 }
 0x32f   : > { %3334 = vmatmul.mubr.f32.gmra.mrb[62].mxu0 %v1737_v0  ;;  %2445 = vst [vmem:[%s5125_s24 + $0x178] sm:$0xff] %v1737_v0 }
 0x387   : > { %v3202_v55 = vpop.f32.mrb[32].mxu0 }
 0x388   : > { %2335 = vst [vmem:[%s5286_s11 + $0x8] sm:$0xff] %v3202_v55  ;;  %v1820_v9 = vpop.f32.mrb[33].mxu0 }
 0x389   : > { %2334 = vst [vmem:[%s5286_s11] sm:$0xff] %v1820_v9 }
 0x38a   : > { %v3258_v58 = vpop.f32.mrb[32].mxu1 }
 0x38b   : > { %4072 = shalt.err (!%p4069_p10)
}
 0x38c   : > { %s4073_s2 = scalar_lea.hbm %s5294_s8, 8192  ;;  %s4077_s18 = scalar_lea.hbm %s5449_s5, 16384 }
 0x38d   : > { %p4074_p11 = scmp.ne.s32.totalorder %s5294_s8, %s4073_s2  ;;  %p4078_p5 = scmp.lt.u32.totalorder %s5294_s8, %s5449_s5 }
 0x38e   : > { %p4079_p2 = scmp.lt.u32.totalorder %s4077_s18, %s4073_s2  ;;  %p4081_p13 = scmp.lt.u32.totalorder %s4073_s2, %s5294_s8 }
 0x38f   : > { %p4075_p4 = pnand %p4074_p11, %p5567_p7 }
 0x390   : > { %p4080_p1 = por %p4079_p2, %p4078_p5 }
 0x391   : > { %p4076_p3 = pneg %p4075_p4 }
 0x392   : > { %p4082_p6 = por %p4081_p13, %p4080_p1 }
 0x394   : > { %p4083_p9 = pnand %p4082_p6, %p4076_p3 }
 0x396   : > { %4086 = shalt.err (!%p4083_p9)
}
 0x397   : > { %s4169_s24 = smov 128   ;;  %s4170_s26 = smov 8   ;;  %2351 = vst [vmem:[%s5286_s11 + $0x88] sm:$0xff] %v3258_v58  ;;  %v1965_v22 = vpop.f32.mrb[33].mxu1  ;;  %v3205_v30 = vpop.f32.mrb[34].mxu0 }
 0x398   : > { %3655 = dma.vmem_to_hbm [thread:$0]  (%p5567_p7), %s5298_s9, 8192, %s5294_s8, %s2468_s1, %s4169_s24, %s4169_s24, %s4170_s26   ;;  %v1830_v28 = vpop.f32.mrb[35].mxu0  ;;  %v3261_v16 = vpop.f32.mrb[34].mxu1 }
 0x399   : > { %2350 = vst [vmem:[%s5286_s11 + $0x80] sm:$0xff] %v1965_v22  ;;  %2337 = vst [vmem:[%s5286_s11 + $0x18] sm:$0xff] %v3205_v30  ;;  %v1975_v38 = vpop.f32.mrb[35].mxu1  ;;  %v3208_v49 = vpop.f32.mrb[36].mxu0  ;;  %s2482_s14 = sshll.u32 %s5286_s11, 4  ;;  %s5392_s1 = scalar_lea.hbm %s5448_s4, %s2685_s12  ;;  %s5394_s14 = int_to_ptr.vmem [resolvable:$true] %s2482_s14 }
 0x39a   : > { %2336 = vst [vmem:[%s5286_s11 + $0x10] sm:$0xff] %v1830_v28  ;;  %2353 = vst [vmem:[%s5286_s11 + $0x98] sm:$0xff] %v3261_v16  ;;  %v1840_v21 = vpop.f32.mrb[37].mxu0  ;;  %v3264_v57 = vpop.f32.mrb[36].mxu1  ;;  %s2463_s16 = scalar_lea.sflag [#allocation5], %s4397_s19  ;;  %s4087_s13 = scalar_lea.vmem %s5394_s14, 8192 }
 0x39b   : > { %2352 = vst [vmem:[%s5286_s11 + $0x90] sm:$0xff] %v1975_v38  ;;  %2339 = vst [vmem:[%s5286_s11 + $0x28] sm:$0xff] %v3208_v49  ;;  %v1985_v17 = vpop.f32.mrb[37].mxu1  ;;  %p4088_p12 = scmp.ne.s32.totalorder %s5394_s14, %s4087_s13  ;;  %s4171_s0 = smov [#allocation9]  }
 0x39c   : > { %2338 = vst [vmem:[%s5286_s11 + $0x20] sm:$0xff] %v1840_v21  ;;  %2355 = vst [vmem:[%s5286_s11 + $0xa8] sm:$0xff] %v3264_v57  ;;  %s4091_s7 = sshll.u32 %s4171_s0, 4  ;;  %s4092_s7 = int_to_ptr.vmem [resolvable:$false] %s4091_s7 }
 0x39d   : > { %2354 = vst [vmem:[%s5286_s11 + $0xa0] sm:$0xff] %v1985_v17  ;;  %p4089_p0 = pnand %p4088_p12, %p5567_p7  ;;  %s4093_s12 = scalar_lea.vmem %s4092_s7, 16384 }
 0x39e   : > { %p4094_p10 = scmp.lt.s32.totalorder %s5394_s14, %s4092_s7  ;;  %p4095_p11 = scmp.lt.s32.totalorder %s4093_s12, %s4087_s13 }
 0x39f   : > { %v3211_v54 = vpop.f32.mrb[38].mxu0  ;;  %p4090_p8 = pneg %p4089_p0 }
 0x3a0   : > { %2341 = vst [vmem:[%s5286_s11 + $0x38] sm:$0xff] %v3211_v54  ;;  %v1850_v12 = vpop.f32.mrb[39].mxu0  ;;  %p4096_p4 = por %p4095_p11, %p4094_p10 }
 0x3a1   : > { %2340 = vst [vmem:[%s5286_s11 + $0x30] sm:$0xff] %v1850_v12 }
 0x3a2   : > { %v3267_v35 = vpop.f32.mrb[38].mxu1  ;;  %p4097_p3 = pnand %p4096_p4, %p4090_p8 }
 0x3a3   : > { %2357 = vst [vmem:[%s5286_s11 + $0xb8] sm:$0xff] %v3267_v35  ;;  %v1995_v20 = vpop.f32.mrb[39].mxu1 }
 0x3a4   : > { %2356 = vst [vmem:[%s5286_s11 + $0xb0] sm:$0xff] %v1995_v20 }
 0x3a7   : > { %v3214_v18 = vpop.f32.mrb[40].mxu0 }
 0x3a8   : > { %2343 = vst [vmem:[%s5286_s11 + $0x48] sm:$0xff] %v3214_v18  ;;  %v1860_v25 = vpop.f32.mrb[41].mxu0 }
 0x3a9   : > { %2342 = vst [vmem:[%s5286_s11 + $0x40] sm:$0xff] %v1860_v25 }
 0x3aa   : > { %v3270_v10 = vpop.f32.mrb[40].mxu1 }
 0x3ab   : > { %2359 = vst [vmem:[%s5286_s11 + $0xc8] sm:$0xff] %v3270_v10  ;;  %v2005_v47 = vpop.f32.mrb[41].mxu1 }
 0x3ac   : > { %2358 = vst [vmem:[%s5286_s11 + $0xc0] sm:$0xff] %v2005_v47 }
 0x3af   : > { %v3217_v2 = vpop.f32.mrb[42].mxu0 }
 0x3b0   : > { %2345 = vst [vmem:[%s5286_s11 + $0x58] sm:$0xff] %v3217_v2  ;;  %v1870_v29 = vpop.f32.mrb[43].mxu0 }
 0x3b1   : > { %2344 = vst [vmem:[%s5286_s11 + $0x50] sm:$0xff] %v1870_v29 }
 0x3b2   : > { %v3273_v53 = vpop.f32.mrb[42].mxu1 }
 0x3b3   : > { %2361 = vst [vmem:[%s5286_s11 + $0xd8] sm:$0xff] %v3273_v53  ;;  %v2015_v63 = vpop.f32.mrb[43].mxu1 }
 0x3b4   : > { %2360 = vst [vmem:[%s5286_s11 + $0xd0] sm:$0xff] %v2015_v63 }
 0x3b7   : > { %v3220_v52 = vpop.f32.mrb[44].mxu0 }
 0x3b8   : > { %2347 = vst [vmem:[%s5286_s11 + $0x68] sm:$0xff] %v3220_v52  ;;  %v1880_v33 = vpop.f32.mrb[45].mxu0 }
 0x3b9   : > { %2346 = vst [vmem:[%s5286_s11 + $0x60] sm:$0xff] %v1880_v33 }
 0x3ba   : > { %v3276_v6 = vpop.f32.mrb[44].mxu1 }
 0x3bb   : > { %2363 = vst [vmem:[%s5286_s11 + $0xe8] sm:$0xff] %v3276_v6  ;;  %v2025_v13 = vpop.f32.mrb[45].mxu1 }
 0x3bc   : > { %2362 = vst [vmem:[%s5286_s11 + $0xe0] sm:$0xff] %v2025_v13 }
 0x3bf   : > { %v3223_v14 = vpop.f32.mrb[46].mxu0 }
 0x3c0   : > { %2349 = vst [vmem:[%s5286_s11 + $0x78] sm:$0xff] %v3223_v14  ;;  %v1890_v37 = vpop.f32.mrb[47].mxu0 }
 0x3c1   : > { %2348 = vst [vmem:[%s5286_s11 + $0x70] sm:$0xff] %v1890_v37 }
 0x3c2   : > { %v3279_v60 = vpop.f32.mrb[46].mxu1 }
 0x3c3   : > { %2365 = vst [vmem:[%s5286_s11 + $0xf8] sm:$0xff] %v3279_v60  ;;  %v2035_v56 = vpop.f32.mrb[47].mxu1 }
 0x3c4   : > { %2364 = vst [vmem:[%s5286_s11 + $0xf0] sm:$0xff] %v2035_v56 }
 0x3c7   : > { %v3314_v48 = vpop.f32.mrb[48].mxu0 }
 0x3c8   : > { %2367 = vst [vmem:[%s5286_s11 + $0x108] sm:$0xff] %v3314_v48  ;;  %v2110_v45 = vpop.f32.mrb[49].mxu0 }
 0x3c9   : > { %2366 = vst [vmem:[%s5286_s11 + $0x100] sm:$0xff] %v2110_v45 }
 0x3ca   : > { %v3370_v31 = vpop.f32.mrb[48].mxu1 }
 0x3cb   : > { %2383 = vst [vmem:[%s5286_s11 + $0x188] sm:$0xff] %v3370_v31  ;;  %v2255_v1 = vpop.f32.mrb[49].mxu1 }
 0x3cc   : > { %2382 = vst [vmem:[%s5286_s11 + $0x180] sm:$0xff] %v2255_v1 }
 0x3cf   : > { %v3317_v5 = vpop.f32.mrb[50].mxu0 }
 0x3d0   : > { %2369 = vst [vmem:[%s5286_s11 + $0x118] sm:$0xff] %v3317_v5  ;;  %v2120_v44 = vpop.f32.mrb[51].mxu0 }
 0x3d1   : > { %2368 = vst [vmem:[%s5286_s11 + $0x110] sm:$0xff] %v2120_v44 }
 0x3d2   : > { %v3373_v46 = vpop.f32.mrb[50].mxu1 }
 0x3d3   : > { %2385 = vst [vmem:[%s5286_s11 + $0x198] sm:$0xff] %v3373_v46  ;;  %v2265_v42 = vpop.f32.mrb[51].mxu1 }
 0x3d4   : > { %2384 = vst [vmem:[%s5286_s11 + $0x190] sm:$0xff] %v2265_v42 }
 0x3d7   : > { %v3320_v34 = vpop.f32.mrb[52].mxu0 }
 0x3d8   : > { %2371 = vst [vmem:[%s5286_s11 + $0x128] sm:$0xff] %v3320_v34  ;;  %v2130_v41 = vpop.f32.mrb[53].mxu0 }
 0x3d9   : > { %2370 = vst [vmem:[%s5286_s11 + $0x120] sm:$0xff] %v2130_v41 }
 0x3da   : > { %v3376_v27 = vpop.f32.mrb[52].mxu1 }
 0x3db   : > { %2387 = vst [vmem:[%s5286_s11 + $0x1a8] sm:$0xff] %v3376_v27  ;;  %v2275_v39 = vpop.f32.mrb[53].mxu1 }
 0x3dc   : > { %2386 = vst [vmem:[%s5286_s11 + $0x1a0] sm:$0xff] %v2275_v39 }
 0x3df   : > { %v3323_v59 = vpop.f32.mrb[54].mxu0 }
 0x3e0   : > { %2373 = vst [vmem:[%s5286_s11 + $0x138] sm:$0xff] %v3323_v59  ;;  %v2140_v19 = vpop.f32.mrb[55].mxu0 }
 0x3e1   : > { %2372 = vst [vmem:[%s5286_s11 + $0x130] sm:$0xff] %v2140_v19 }
 0x3e2   : > { %v3379_v7 = vpop.f32.mrb[54].mxu1 }
 0x3e3   : > { %2389 = vst [vmem:[%s5286_s11 + $0x1b8] sm:$0xff] %v3379_v7  ;;  %v2285_v43 = vpop.f32.mrb[55].mxu1 }
 0x3e4   : > { %2388 = vst [vmem:[%s5286_s11 + $0x1b0] sm:$0xff] %v2285_v43 }
 0x3e7   : > { %v3326_v51 = vpop.f32.mrb[56].mxu0 }
 0x3e8   : > { %2375 = vst [vmem:[%s5286_s11 + $0x148] sm:$0xff] %v3326_v51  ;;  %v2150_v8 = vpop.f32.mrb[57].mxu0 }
 0x3e9   : > { %2374 = vst [vmem:[%s5286_s11 + $0x140] sm:$0xff] %v2150_v8 }
 0x3ea   : > { %v3382_v11 = vpop.f32.mrb[56].mxu1 }
 0x3eb   : > { %2391 = vst [vmem:[%s5286_s11 + $0x1c8] sm:$0xff] %v3382_v11  ;;  %v2295_v32 = vpop.f32.mrb[57].mxu1 }
 0x3ec   : > { %2390 = vst [vmem:[%s5286_s11 + $0x1c0] sm:$0xff] %v2295_v32 }
 0x3ef   : > { %v3329_v62 = vpop.f32.mrb[58].mxu0 }
 0x3f0   : > { %2377 = vst [vmem:[%s5286_s11 + $0x158] sm:$0xff] %v3329_v62  ;;  %v2160_v23 = vpop.f32.mrb[59].mxu0 }
 0x3f1   : > { %2376 = vst [vmem:[%s5286_s11 + $0x150] sm:$0xff] %v2160_v23 }
 0x3f2   : > { %v3385_v61 = vpop.f32.mrb[58].mxu1 }
 0x3f3   : > { %2393 = vst [vmem:[%s5286_s11 + $0x1d8] sm:$0xff] %v3385_v61  ;;  %v2305_v50 = vpop.f32.mrb[59].mxu1 }
 0x3f4   : > { %2392 = vst [vmem:[%s5286_s11 + $0x1d0] sm:$0xff] %v2305_v50 }
 0x3f7   : > { %v3332_v26 = vpop.f32.mrb[60].mxu0 }
 0x3f8   : > { %2379 = vst [vmem:[%s5286_s11 + $0x168] sm:$0xff] %v3332_v26  ;;  %v2170_v40 = vpop.f32.mrb[61].mxu0 }
 0x3f9   : > { %2378 = vst [vmem:[%s5286_s11 + $0x160] sm:$0xff] %v2170_v40 }
 0x3fa   : > { %v3388_v3 = vpop.f32.mrb[60].mxu1 }
 0x3fb   : > { %2395 = vst [vmem:[%s5286_s11 + $0x1e8] sm:$0xff] %v3388_v3  ;;  %v2315_v24 = vpop.f32.mrb[61].mxu1 }
 0x3fc   : > { %2394 = vst [vmem:[%s5286_s11 + $0x1e0] sm:$0xff] %v2315_v24 }
 0x401   : > { %v3391_v15 = vpop.f32.mrb[62].mxu1 }
 0x402   : > { %2397 = vst [vmem:[%s5286_s11 + $0x1f8] sm:$0xff] %v3391_v15  ;;  %v3335_v4 = vpop.f32.mrb[62].mxu0  ;;  %v2325_v36 = vpop.f32.mrb[63].mxu1 }
 0x403   : > { %2381 = vst [vmem:[%s5286_s11 + $0x178] sm:$0xff] %v3335_v4  ;;  %2396 = vst [vmem:[%s5286_s11 + $0x1f0] sm:$0xff] %v2325_v36  ;;  %v2180_v0 = vpop.f32.mrb[63].mxu0 }
 0x404   : > { %2380 = vst [vmem:[%s5286_s11 + $0x170] sm:$0xff] %v2180_v0 }
 0x405   : > { %4100 = shalt.err (!%p4097_p3)
}
 0x406   : > { %s4101_s11 = scalar_lea.hbm %s5392_s1, 8192  ;;  %s4105_s17 = scalar_lea.hbm %s5448_s4, 16384 }
 0x407   : > { %p4102_p5 = scmp.ne.s32.totalorder %s5392_s1, %s4101_s11  ;;  %p4106_p13 = scmp.lt.u32.totalorder %s5392_s1, %s5448_s4 }
 0x408   : > { %p4107_p6 = scmp.lt.u32.totalorder %s4105_s17, %s4101_s11  ;;  %p4109_p12 = scmp.lt.u32.totalorder %s4101_s11, %s5392_s1 }
 0x409   : > { %p4103_p2 = pnand %p4102_p5, %p5567_p7 }
 0x40a   : > { %p4108_p9 = por %p4107_p6, %p4106_p13 }
 0x40b   : > { %p4104_p1 = pneg %p4103_p2 }
 0x40c   : > { %p4110_p0 = por %p4109_p12, %p4108_p9 }
 0x40e   : > { %p4111_p8 = pnand %p4110_p0, %p4104_p1 }
 0x410   : > { %4114 = shalt.err (!%p4111_p8)
}
 0x411   : > { %3654 = dma.vmem_to_hbm [thread:$0]  (%p5567_p7), %s5394_s14, 8192, %s5392_s1, %s2463_s16, %s4169_s24, %s4169_s24, %s4170_s26  }
 0x412 PF: > { %s2514_s29 = sand.u32 1, %s4149_s20   ;;  %p5568_p10 = scmp.ne.s32.totalorder %s5492_s6, 0 }
 0x413   : > { %p5569_p11 = scmp.ge.s32.totalorder %s4161_s23, 2  ;;  %s2515_s27 = scalar_lea.sflag [#allocation5], %s2514_s29 }
 0x415   : > { %p3669_p4 = pnand %p5569_p11, %p5568_p10 }
 0x417   : > { %4140 = dma.done.wait (!%p3669_p4), %s2515_s27, 8192  }
 0x418   : > { %4142 = vsyncadd (!%p3669_p4), %s2515_s27, 4294959104  ;;  %s2524_s30 = scalar_lea.sflag [#allocation11], %s2514_s29 }
 0x419   : > { %4144 = dma.done.wait (!%p3669_p4), %s2524_s30, 8192  }
 0x41a   : > { %4146 = vsyncadd (!%p3669_p4), %s2524_s30, 4294959104  ;;  %p26_p7 = scmp.ge.s32.totalorder %s4230_s25, 4   ;;  %s5570_s20 = smov %s4153_s21 }
 0x41b   : > { %s5571_s21 = smov %s4157_s22  ;;  %s5572_s22 = smov %s4242_s28 }
 0x41c   : > { %s5573_s23 = smov %s4230_s25  ;;  %28 = sbr.rel (!%p26_p7) target bundleno = 13 (0xd), region = 122 }
 0x423   :  { %2529 = vsyncpa [#allocation4], 1 }
 0x424   :  { %2531 = vsyncpa [#allocation4 + $0x1], 1 }
 0x425   :  { %2532 = vsyncpa [#allocation7], 1 }
 0x426   :  { %2534 = vsyncpa [#allocation7 + $0x1], 1 }
 0x427   :  { %2535 = vsyncpa [#allocation5], 1 }
 0x428   :  { %2537 = vsyncpa [#allocation5 + $0x1], 1 }
 0x429   :  { %2538 = vsyncpa [#allocation11], 1 }
 0x42a   :  { %2540 = vsyncpa [#allocation11 + $0x1], 1 }

</bundles_post_ra>
